<compile_context>
chip_gen: v7x
topology: tpu7x:2x2x1
jax: 0.10.0
libtpu: 0.0.40
codegen_flags: <defaults>
</compile_context>

<pallas_src>
from typing import NamedTuple

import jax
import jax.numpy as jnp
from jax.experimental import pallas as pl
from jax.experimental.pallas import tpu as pltpu

EPS = 1e-5  # PyTorch BatchNorm1d default eps


# --------------------------------------------------------------------------- #
# Kernel: x @ W1' + b1' -> PReLU -> @ W2' + b2' -> PReLU -> @ W3 + b3
# (BatchNorm already folded into W1'/b1' and W2'/b2'; dropout is identity.)
# --------------------------------------------------------------------------- #
def lenet_classifier_kernel(x_ref, w1_ref, v1_ref, w2_ref, v2_ref, w3_ref,
                            out_ref):
    x = x_ref[...].astype(w1_ref.dtype)          # f32 -> bf16 inside the kernel

    b1 = v1_ref[0:1, :]                          # folded fc1 bias   (1, 512) f32
    a1 = v1_ref[1:2, :]                          # PReLU1 alpha      (1, 512) f32
    b2 = v2_ref[0:1, :]                          # folded fc2 bias   (1, 128) f32
    a2 = v2_ref[1:2, :]                          # PReLU2 alpha      (1, 128) f32
    b3 = v2_ref[2:3, :]                          # output bias       (1, 128) f32

    # fc1 (+ folded BN1) + PReLU1
    h1 = jnp.dot(x, w1_ref[...], preferred_element_type=jnp.float32) + b1
    h1 = jnp.where(h1 > 0, h1, a1 * h1)
    # TODO(synk): dropout1 is identity here (inference / eval semantics).

    # fc2 (+ folded BN2) + PReLU2
    h2 = jnp.dot(h1.astype(w2_ref.dtype), w2_ref[...],
                 preferred_element_type=jnp.float32) + b2
    h2 = jnp.where(h2 > 0, h2, a2 * h2)
    # TODO(synk): dropout2 is identity here (inference / eval semantics).

    # output head
    out_ref[...] = (
        jnp.dot(h2.astype(w3_ref.dtype), w3_ref[...],
                preferred_element_type=jnp.float32) + b3
    ).astype(out_ref.dtype)


# --------------------------------------------------------------------------- #
# One-time parameter preparation: BN fold, lane padding, bf16 cast, packing.
# --------------------------------------------------------------------------- #
class PreparedParams(NamedTuple):
    w1: jax.Array      # (1024, 512) bf16 — fc1 weight with BN1 folded, 500->512 pad
    v1: jax.Array      # (2, 512)  f32   — rows: [folded b1, prelu alpha1]
    w2: jax.Array      # (512, 128) bf16 — fc2 weight with BN2 folded, padded
    v2: jax.Array      # (3, 128)  f32   — rows: [folded b2, prelu alpha2, b3]
    w3: jax.Array      # (128, 128) bf16 — output weight, padded
    num_classes: int


def _pad_to(a, axis, mult):
    pad = (-a.shape[axis]) % mult
    if pad == 0:
        return a
    widths = [(0, 0)] * a.ndim
    widths[axis] = (0, pad)
    return jnp.pad(a, widths)


def prepare_params(params, *, weight_dtype=jnp.bfloat16):
    """Fold eval-mode BatchNorm into fc1/fc2, pad feature dims to multiples of
    128 (zero padding is exact through PReLU and downstream matmuls), cast
    matmul weights to bf16, and pack the tiny per-channel vectors.  Call once
    and reuse the result across forward calls."""
    (w1, b1, g1, be1, m1, v1, a1,
     w2, b2, g2, be2, m2, v2, a2,
     w3, b3) = params
    num_classes = w3.shape[1]

    s1 = g1 * jax.lax.rsqrt(v1 + EPS)            # (1, 500)
    w1f = w1 * s1                                # (1024, 500)
    b1f = (b1 - m1) * s1 + be1                   # (1, 500)
    s2 = g2 * jax.lax.rsqrt(v2 + EPS)            # (1, 100)
    w2f = w2 * s2                                # (500, 100)
    b2f = (b2 - m2) * s2 + be2                   # (1, 100)

    w1p = _pad_to(w1f, 1, 128).astype(weight_dtype)                   # (1024, 512)
    w2p = _pad_to(_pad_to(w2f, 0, 128), 1, 128).astype(weight_dtype)  # (512, 128)
    w3p = _pad_to(_pad_to(w3, 0, 128), 1, 128).astype(weight_dtype)   # (128, 128)

    vec1 = jnp.concatenate(
        [_pad_to(b1f, 1, 128), _pad_to(a1, 1, 128)], axis=0)          # (2, 512) f32
    vec2 = jnp.concatenate(
        [_pad_to(b2f, 1, 128), _pad_to(a2, 1, 128), _pad_to(b3, 1, 128)],
        axis=0)                                                       # (3, 128) f32

    return PreparedParams(w1p, vec1, w2p, vec2, w3p, num_classes)


# --------------------------------------------------------------------------- #
# Wrapper: batch-tiled 1-D parallel grid, resident weights, masked ragged tail.
# --------------------------------------------------------------------------- #
def _choose_batch_tile(batch, tile_b):
    # Small batch: one block covering the full batch dim (block == full dim,
    # so the (8,128) divisibility rule is always satisfied).
    if batch <= 256:
        return batch
    # Large batch: tile is a multiple of 256 (fills the 2x256x256 MXU on
    # v6e/v7x; 128-row fill is only optimal on v5e) and small enough that the
    # grid has >= 2 parallel steps, so v7x's second TensorCore gets work.
    half = -(-batch // 2)               # cdiv(batch, 2)
    tb = -(-half // 256) * 256          # round up to a multiple of 256
    return min(tile_b, tb)


def lenet_classifier_apply(x, prep: PreparedParams, *, tile_b=512,
                           out_dtype=jnp.float32):
    batch, in_dim = x.shape
    n_out_p = prep.w3.shape[1]

    tb = _choose_batch_tile(batch, tile_b)
    grid = (pl.cdiv(batch, tb),)        # ragged last block: OOB output rows are
                                        # masked on writeback, no batch padding

    def resident(shape):
        # Same block index every grid step -> DMA'd once, stays VMEM-resident.
        return pl.BlockSpec(shape, lambda i: (0, 0))

    flops = 2 * batch * (in_dim * prep.w1.shape[1]
                         + prep.w2.shape[0] * prep.w2.shape[1]
                         + prep.w3.shape[0] * n_out_p)
    bytes_accessed = int(
        x.size * x.dtype.itemsize
        + sum(a.size * a.dtype.itemsize
              for a in (prep.w1, prep.v1, prep.w2, prep.v2, prep.w3))
        + batch * n_out_p * jnp.dtype(out_dtype).itemsize)

    out = pl.pallas_call(
        lenet_classifier_kernel,
        out_shape=jax.ShapeDtypeStruct((batch, n_out_p), out_dtype),
        grid=grid,
        in_specs=[
            pl.BlockSpec((tb, in_dim), lambda i: (i, 0)),     # streamed x tiles
            resident(prep.w1.shape),
            resident(prep.v1.shape),
            resident(prep.w2.shape),
            resident(prep.v2.shape),
            resident(prep.w3.shape),
        ],
        out_specs=pl.BlockSpec((tb, n_out_p), lambda i: (i, 0)),
        compiler_params=pltpu.CompilerParams(
            dimension_semantics=("parallel",),
            vmem_limit_bytes=32 << 20,
        ),
        cost_estimate=pl.CostEstimate(
            flops=flops, transcendentals=0, bytes_accessed=bytes_accessed),
    )(x, prep.w1, prep.v1, prep.w2, prep.v2, prep.w3)

    return out[:, :prep.num_classes]


def lenet_classifier(x, params, *, tile_b=512, out_dtype=jnp.float32):
    """Convenience one-shot entry point (prepares params every call; prefer
    prepare_params() + lenet_classifier_apply() when calling repeatedly)."""
    return lenet_classifier_apply(x, prepare_params(params),
                                  tile_b=tile_b, out_dtype=out_dtype)


# --------------------------------------------------------------------------- #
# Pure-JAX f32 reference (un-folded, un-padded) and parameter init.
# --------------------------------------------------------------------------- #
def _reference(x, params):
    (w1, b1, g1, be1, m1, v1, a1,
     w2, b2, g2, be2, m2, v2, a2,
     w3, b3) = params
    h1 = x @ w1 + b1
    h1 = (h1 - m1) * jax.lax.rsqrt(v1 + EPS) * g1 + be1
    h1 = jnp.where(h1 > 0, h1, a1 * h1)
    h2 = h1 @ w2 + b2
    h2 = (h2 - m2) * jax.lax.rsqrt(v2 + EPS) * g2 + be2
    h2 = jnp.where(h2 > 0, h2, a2 * h2)
    return h2 @ w3 + b3


def _init_params(key, num_classes=7):
    ks = jax.random.split(key, 12)

    def linear_init(kw, kb, fan_in, fan_out):
        bound = 1.0 / (fan_in ** 0.5)
        w = jax.random.uniform(kw, (fan_in, fan_out), jnp.float32, -bound, bound)
        b = jax.random.uniform(kb, (1, fan_out), jnp.float32, -bound, bound)
        return w, b

    w1, b1 = linear_init(ks[0], ks[1], 1024, 500)
    w2, b2 = linear_init(ks[2], ks[3], 500, 100)
    w3, b3 = linear_init(ks[4], ks[5], 100, num_classes)

    # BatchNorm1d eval-mode params / running stats, made non-trivial.
    g1 = jnp.ones((1, 500), jnp.float32)
    be1 = jnp.zeros((1, 500), jnp.float32)
    m1 = 0.1 * jax.random.normal(ks[6], (1, 500), jnp.float32)
    v1 = 1.0 + 0.1 * jax.random.uniform(ks[7], (1, 500), jnp.float32)

    g2 = jnp.ones((1, 100), jnp.float32)
    be2 = jnp.zeros((1, 100), jnp.float32)
    m2 = 0.1 * jax.random.normal(ks[8], (1, 100), jnp.float32)
    v2 = 1.0 + 0.1 * jax.random.uniform(ks[9], (1, 100), jnp.float32)

    # PReLU per-channel slopes (PyTorch default init = 0.25).
    a1 = jnp.full((1, 500), 0.25, jnp.float32)
    a2 = jnp.full((1, 100), 0.25, jnp.float32)

    return (w1, b1, g1, be1, m1, v1, a1,
            w2, b2, g2, be2, m2, v2, a2,
            w3, b3)


if __name__ == "__main__":
    key = jax.random.PRNGKey(0)
    k_x1, k_x2, k_p = jax.random.split(key, 3)

    params = _init_params(k_p, num_classes=7)
    prep = jax.block_until_ready(prepare_params(params))   # one-time host prep

    # Small batch: single-block path (grid=(1,)).  fc1 expects 1024 features.
    x_small = jax.random.normal(k_x1, (8, 1024), jnp.float32)
    out_small = jax.block_until_ready(lenet_classifier_apply(x_small, prep))
    ref_small = _reference(x_small, params)
    assert out_small.shape == (8, 7)
    assert jnp.allclose(out_small, ref_small, atol=5e-2, rtol=1e-2), \
        "small-batch mismatch vs reference"

    # Larger batch: exercises the multi-step grid with a ragged (masked) tail.
    x_big = jax.random.normal(k_x2, (300, 1024), jnp.float32)
    out_big = jax.block_until_ready(lenet_classifier_apply(x_big, prep))
    ref_big = _reference(x_big, params)
    assert out_big.shape == (300, 7)
    assert jnp.allclose(out_big, ref_big, atol=5e-2, rtol=1e-2), \
        "tiled-batch mismatch vs reference"

    print("KERNEL_OK")
</pallas_src>

<mosaic_0001>
module attributes {stable_mosaic.version = 11 : i64} {
  func.func @lenet_classifier_kernel(%arg0: i32, %arg1: memref<8x1024xf32, #tpu.memory_space<vmem>>, %arg2: memref<1024x512xbf16, #tpu.memory_space<vmem>>, %arg3: memref<2x512xf32, #tpu.memory_space<vmem>>, %arg4: memref<512x128xbf16, #tpu.memory_space<vmem>>, %arg5: memref<3x128xf32, #tpu.memory_space<vmem>>, %arg6: memref<128x128xbf16, #tpu.memory_space<vmem>>, %arg7: memref<8x128xf32, #tpu.memory_space<vmem>>) attributes {dimension_semantics = [#tpu.dimension_semantics<parallel>], iteration_bounds = array<i64: 1>, scalar_prefetch = 0 : i64, scratch_operands = 0 : i64, tpu.core_type = #tpu.core_type<tc>, window_params = [{transform_indices = @transform_0, window_bounds = array<i64: 8, 1024>}, {pipeline_mode = #tpu.pipeline_mode<synchronous>, transform_indices = @transform_1, window_bounds = array<i64: 1024, 512>}, {pipeline_mode = #tpu.pipeline_mode<synchronous>, transform_indices = @transform_2, window_bounds = array<i64: 2, 512>}, {pipeline_mode = #tpu.pipeline_mode<synchronous>, transform_indices = @transform_3, window_bounds = array<i64: 512, 128>}, {pipeline_mode = #tpu.pipeline_mode<synchronous>, transform_indices = @transform_4, window_bounds = array<i64: 3, 128>}, {pipeline_mode = #tpu.pipeline_mode<synchronous>, transform_indices = @transform_5, window_bounds = array<i64: 128, 128>}, {transform_indices = @transform_6, window_bounds = array<i64: 8, 128>}]} {
    %c0 = arith.constant 0 : index
    %c0_0 = arith.constant 0 : index
    %0 = vector.load %arg1[%c0, %c0_0] : memref<8x1024xf32, #tpu.memory_space<vmem>>, vector<8x1024xf32>
    %1 = arith.truncf %0 : vector<8x1024xf32> to vector<8x1024xbf16>
    %c0_1 = arith.constant 0 : index
    %c0_2 = arith.constant 0 : index
    %2 = vector.load %arg3[%c0_1, %c0_2] : memref<2x512xf32, #tpu.memory_space<vmem>>, vector<1x512xf32>
    %c1 = arith.constant 1 : index
    %c0_3 = arith.constant 0 : index
    %3 = vector.load %arg3[%c1, %c0_3] : memref<2x512xf32, #tpu.memory_space<vmem>>, vector<1x512xf32>
    %c0_4 = arith.constant 0 : index
    %c0_5 = arith.constant 0 : index
    %4 = vector.load %arg5[%c0_4, %c0_5] : memref<3x128xf32, #tpu.memory_space<vmem>>, vector<1x128xf32>
    %c1_6 = arith.constant 1 : index
    %c0_7 = arith.constant 0 : index
    %5 = vector.load %arg5[%c1_6, %c0_7] : memref<3x128xf32, #tpu.memory_space<vmem>>, vector<1x128xf32>
    %c2 = arith.constant 2 : index
    %c0_8 = arith.constant 0 : index
    %6 = vector.load %arg5[%c2, %c0_8] : memref<3x128xf32, #tpu.memory_space<vmem>>, vector<1x128xf32>
    %c0_9 = arith.constant 0 : index
    %c0_10 = arith.constant 0 : index
    %7 = vector.load %arg2[%c0_9, %c0_10] : memref<1024x512xbf16, #tpu.memory_space<vmem>>, vector<1024x512xbf16>
    %cst = arith.constant dense<0.000000e+00> : vector<8x512xf32>
    %8 = tpu.matmul %1, %7, %cst {dimension_numbers = #tpu.dot_dimension_numbers<[1], [0], [0], [1], [0, 0, 1, 1], [], []>} : vector<8x1024xbf16>, vector<1024x512xbf16>, vector<8x512xf32> -> vector<8x512xf32>
    %9 = vector.broadcast %2 : vector<1x512xf32> to vector<8x512xf32>
    %10 = arith.addf %8, %9 : vector<8x512xf32>
    %cst_11 = arith.constant 0.000000e+00 : f32
    %11 = vector.broadcast %cst_11 : f32 to vector<8x512xf32>
    %12 = arith.cmpf ogt, %10, %11 : vector<8x512xf32>
    %13 = vector.broadcast %3 : vector<1x512xf32> to vector<8x512xf32>
    %14 = arith.mulf %13, %10 : vector<8x512xf32>
    %15 = arith.select %12, %10, %14 : vector<8x512xi1>, vector<8x512xf32>
    %16 = arith.truncf %15 : vector<8x512xf32> to vector<8x512xbf16>
    %c0_12 = arith.constant 0 : index
    %c0_13 = arith.constant 0 : index
    %17 = vector.load %arg4[%c0_12, %c0_13] : memref<512x128xbf16, #tpu.memory_space<vmem>>, vector<512x128xbf16>
    %cst_14 = arith.constant dense<0.000000e+00> : vector<8x128xf32>
    %18 = tpu.matmul %16, %17, %cst_14 {dimension_numbers = #tpu.dot_dimension_numbers<[1], [0], [0], [1], [0, 0, 1, 1], [], []>} : vector<8x512xbf16>, vector<512x128xbf16>, vector<8x128xf32> -> vector<8x128xf32>
    %19 = vector.broadcast %4 : vector<1x128xf32> to vector<8x128xf32>
    %20 = arith.addf %18, %19 : vector<8x128xf32>
    %cst_15 = arith.constant 0.000000e+00 : f32
    %21 = vector.broadcast %cst_15 : f32 to vector<8x128xf32>
    %22 = arith.cmpf ogt, %20, %21 : vector<8x128xf32>
    %23 = vector.broadcast %5 : vector<1x128xf32> to vector<8x128xf32>
    %24 = arith.mulf %23, %20 : vector<8x128xf32>
    %25 = arith.select %22, %20, %24 : vector<8x128xi1>, vector<8x128xf32>
    %26 = arith.truncf %25 : vector<8x128xf32> to vector<8x128xbf16>
    %c0_16 = arith.constant 0 : index
    %c0_17 = arith.constant 0 : index
    %27 = vector.load %arg6[%c0_16, %c0_17] : memref<128x128xbf16, #tpu.memory_space<vmem>>, vector<128x128xbf16>
    %cst_18 = arith.constant dense<0.000000e+00> : vector<8x128xf32>
    %28 = tpu.matmul %26, %27, %cst_18 {dimension_numbers = #tpu.dot_dimension_numbers<[1], [0], [0], [1], [0, 0, 1, 1], [], []>} : vector<8x128xbf16>, vector<128x128xbf16>, vector<8x128xf32> -> vector<8x128xf32>
    %29 = vector.broadcast %6 : vector<1x128xf32> to vector<8x128xf32>
    %30 = arith.addf %28, %29 : vector<8x128xf32>
    %c0_19 = arith.constant 0 : index
    %c0_20 = arith.constant 0 : index
    %31 = vector.load %arg7[%c0_19, %c0_20] : memref<8x128xf32, #tpu.memory_space<vmem>>, vector<8x128xf32>
    tpu.vector_store %arg7[%c0_19, %c0_20], %30 {strides = array<i32>} : memref<8x128xf32, #tpu.memory_space<vmem>>, vector<8x128xf32>,
    return
  }
  func.func @transform_0(%arg0: i32) -> (i32, i32) {
    %c0_i32 = arith.constant 0 : i32
    %c0_i32_0 = arith.constant 0 : i32
    return %arg0, %c0_i32 : i32, i32
  }
  func.func @transform_1(%arg0: i32) -> (i32, i32) {
    %c0_i32 = arith.constant 0 : i32
    %c0_i32_0 = arith.constant 0 : i32
    %c0_i32_1 = arith.constant 0 : i32
    return %c0_i32, %c0_i32_0 : i32, i32
  }
  func.func @transform_2(%arg0: i32) -> (i32, i32) {
    %c0_i32 = arith.constant 0 : i32
    %c0_i32_0 = arith.constant 0 : i32
    %c0_i32_1 = arith.constant 0 : i32
    return %c0_i32, %c0_i32_0 : i32, i32
  }
  func.func @transform_3(%arg0: i32) -> (i32, i32) {
    %c0_i32 = arith.constant 0 : i32
    %c0_i32_0 = arith.constant 0 : i32
    %c0_i32_1 = arith.constant 0 : i32
    return %c0_i32, %c0_i32_0 : i32, i32
  }
  func.func @transform_4(%arg0: i32) -> (i32, i32) {
    %c0_i32 = arith.constant 0 : i32
    %c0_i32_0 = arith.constant 0 : i32
    %c0_i32_1 = arith.constant 0 : i32
    return %c0_i32, %c0_i32_0 : i32, i32
  }
  func.func @transform_5(%arg0: i32) -> (i32, i32) {
    %c0_i32 = arith.constant 0 : i32
    %c0_i32_0 = arith.constant 0 : i32
    %c0_i32_1 = arith.constant 0 : i32
    return %c0_i32, %c0_i32_0 : i32, i32
  }
  func.func @transform_6(%arg0: i32) -> (i32, i32) {
    %c0_i32 = arith.constant 0 : i32
    %c0_i32_0 = arith.constant 0 : i32
    return %arg0, %c0_i32 : i32, i32
  }
}

</mosaic_0001>

<bundles_post_ra>
// kernel: tpu_custom_call.1
= control target key start
LH: loop header
LB: loop body
LE: loop exit
PB: predicated region body
PF: predicated region fallthrough
CT: control target
= control target key end

     0   :  { %11 = vsyncpa [#allocation3], 0  ;;  %s3626_s0 = inlined_call_operand.hbm [shape: f32[8,1024], index: 0, kind: input, shape index: {}]   ;;  %s3627_s1 = inlined_call_operand.hbm [shape: bf16[1024,512], index: 1, kind: input, shape index: {}]   ;;  %s3628_s2 = inlined_call_operand.hbm [shape: f32[2,512], index: 2, kind: input, shape index: {}]   ;;  %s3629_s3 = inlined_call_operand.hbm [shape: bf16[512,128], index: 3, kind: input, shape index: {}]   ;;  %s3630_s4 = inlined_call_operand.vmem [shape: f32[3,128], index: 4, kind: input, shape index: {}]   ;;  %s3631_s5 = inlined_call_operand.hbm [shape: bf16[128,128], index: 5, kind: input, shape index: {}]   ;;  %s3632_s6 = inlined_call_operand.hbm [shape: f32[8,128], index: 6, kind: output, shape index: {}]  }
   0x1   :  { %12 = vsyncpa [#allocation6], 0 }
   0x2   :  { %13 = vsyncpa [#allocation9], 0 }
   0x3   :  { %14 = vsyncpa [#allocation4], 0  ;;  %s3483_s21 = smov [#allocation5]   ;;  %s3343_s25 = scalar_lea.hbm %s3627_s1, 32768 }
   0x4   :  { %s30_s22 = sshll.u32 %s3483_s21, 4  ;;  %p3344_p0 = scmp.ne.s32.totalorder %s3627_s1, %s3343_s25  ;;  %s31_s22 = int_to_ptr.vmem [resolvable:$true] %s30_s22 }
   0x5   :  { %p3347_p1 = scmp.lt.u32.totalorder %s3343_s25, %s3627_s1 }
   0x7   :  { %p3349_p2 = pnand %p3347_p1, %p3344_p0 }
   0x9   :  { %3352 = shalt.err (!%p3349_p2)
}
   0xa   :  { %s3353_s30 = scalar_lea.vmem %s31_s22, 32768  ;;  %p3358_p4 = scmp.lt.s32.totalorder %s31_s22, %s31_s22 }
   0xb   :  { %p3354_p3 = scmp.ne.s32.totalorder %s31_s22, %s3353_s30  ;;  %p3359_p5 = scmp.lt.s32.totalorder %s3353_s30, %s3353_s30 }
   0xd   :  { %p3360_p6 = por %p3359_p5, %p3358_p4 }
   0xf   :  { %p3361_p7 = pnand %p3360_p6, %p3354_p3 }
  0x11   :  { %3364 = shalt.err (!%p3361_p7)
}
  0x12   :  { %s3484_s7 = smov 256   ;;  %s3485_s8 = smov 16  }
  0x13   :  { %36 = dma.hbm_to_vmem [thread:$0]  %s3627_s1, 32768, %s31_s22, [#allocation6], %s3484_s7, %s3484_s7, %s3485_s8  }
  0x14   :  { %s3486_s11 = smov [#allocation8]   ;;  %s3365_s15 = scalar_lea.hbm %s3629_s3, 4096 }
  0x15   :  { %s52_s12 = sshll.u32 %s3486_s11, 4  ;;  %p3366_p8 = scmp.ne.s32.totalorder %s3629_s3, %s3365_s15  ;;  %s53_s12 = int_to_ptr.vmem [resolvable:$true] %s52_s12 }
  0x16   :  { %p3369_p9 = scmp.lt.u32.totalorder %s3365_s15, %s3629_s3 }
  0x18   :  { %p3371_p10 = pnand %p3369_p9, %p3366_p8 }
  0x1a   :  { %3374 = shalt.err (!%p3371_p10)
}
  0x1b   :  { %s3375_s20 = scalar_lea.vmem %s53_s12, 4096  ;;  %p3380_p12 = scmp.lt.s32.totalorder %s53_s12, %s53_s12 }
  0x1c   :  { %p3376_p11 = scmp.ne.s32.totalorder %s53_s12, %s3375_s20  ;;  %p3381_p13 = scmp.lt.s32.totalorder %s3375_s20, %s3375_s20 }
  0x1e   :  { %p3382_p0 = por %p3381_p13, %p3380_p12 }
  0x20   :  { %p3383_p1 = pnand %p3382_p0, %p3376_p11 }
  0x22   :  { %3386 = shalt.err (!%p3383_p1)
}
  0x23   :  { %s3487_s1 = smov 64   ;;  %s3488_s21 = smov 4  }
  0x24   :  { %58 = dma.hbm_to_vmem [thread:$0]  %s3629_s3, 4096, %s53_s12, [#allocation9], %s3487_s1, %s3487_s1, %s3488_s21  }
  0x25   :  { %s3489_s24 = smov [#allocation2]   ;;  %s3490_s26 = smov [#allocation7]  }
  0x26   :  { %s21_s25 = sshll.u32 %s3489_s24, 4  ;;  %s43_s27 = sshll.u32 %s3490_s26, 4  ;;  %s22_s25 = int_to_ptr.vmem [resolvable:$true] %s21_s25  ;;  %s44_s27 = int_to_ptr.vmem [resolvable:$true] %s43_s27 }
  0x27   :  { %s3387_s30 = scalar_lea.hbm %s3626_s0, 1024 }
  0x28   :  { %p3388_p2 = scmp.ne.s32.totalorder %s3626_s0, %s3387_s30  ;;  %p3391_p3 = scmp.lt.u32.totalorder %s3387_s30, %s3626_s0 }
  0x2a   :  { %p3393_p4 = pnand %p3391_p3, %p3388_p2 }
  0x2c   :  { %3396 = shalt.err (!%p3393_p4)
}
  0x2d   :  { %s3397_s3 = scalar_lea.vmem %s22_s25, 1024  ;;  %p3402_p6 = scmp.lt.s32.totalorder %s22_s25, %s22_s25 }
  0x2e   :  { %p3398_p5 = scmp.ne.s32.totalorder %s22_s25, %s3397_s3  ;;  %p3403_p7 = scmp.lt.s32.totalorder %s3397_s3, %s3397_s3 }
  0x30   :  { %p3404_p8 = por %p3403_p7, %p3402_p6 }
  0x32   :  { %p3405_p9 = pnand %p3404_p8, %p3398_p5 }
  0x34   :  { %3408 = shalt.err (!%p3405_p9)
}
  0x35   :  { %24 = dma.hbm_to_vmem [thread:$0]  %s3626_s0, 1024, %s22_s25, [#allocation3]  }
  0x36   :  { %s3409_s15 = scalar_lea.hbm %s3628_s2, 128 }
  0x37   :  { %p3410_p10 = scmp.ne.s32.totalorder %s3628_s2, %s3409_s15  ;;  %p3413_p11 = scmp.lt.u32.totalorder %s3409_s15, %s3628_s2 }
  0x39   :  { %p3415_p12 = pnand %p3413_p11, %p3410_p10 }
  0x3b   :  { %3418 = shalt.err (!%p3415_p12)
}
  0x3c   :  { %s3419_s20 = scalar_lea.vmem %s44_s27, 128  ;;  %p3424_p0 = scmp.lt.s32.totalorder %s44_s27, %s44_s27 }
  0x3d   :  { %p3420_p13 = scmp.ne.s32.totalorder %s44_s27, %s3419_s20  ;;  %p3425_p1 = scmp.lt.s32.totalorder %s3419_s20, %s3419_s20 }
  0x3f   :  { %p3426_p2 = por %p3425_p1, %p3424_p0 }
  0x41   :  { %p3427_p3 = pnand %p3426_p2, %p3420_p13 }
  0x43   :  { %3430 = shalt.err (!%p3427_p3)
}
  0x44   :  { %46 = dma.hbm_to_vmem [thread:$0]  %s3628_s2, 128, %s44_s27, [#allocation6]  }
  0x45   :  { %s3491_s23 = smov [#allocation10]   ;;  %s3431_s28 = scalar_lea.hbm %s3631_s5, 1024 }
  0x46   :  { %s66_s24 = sshll.u32 %s3491_s23, 4  ;;  %p3432_p4 = scmp.ne.s32.totalorder %s3631_s5, %s3431_s28  ;;  %s67_s24 = int_to_ptr.vmem [resolvable:$true] %s66_s24 }
  0x47   :  { %p3435_p5 = scmp.lt.u32.totalorder %s3431_s28, %s3631_s5 }
  0x49   :  { %p3437_p6 = pnand %p3435_p5, %p3432_p4 }
  0x4b   :  { %3440 = shalt.err (!%p3437_p6)
}
  0x4c   :  { %s3441_s9 = scalar_lea.vmem %s67_s24, 1024  ;;  %p3446_p8 = scmp.lt.s32.totalorder %s67_s24, %s67_s24 }
  0x4d   :  { %p3442_p7 = scmp.ne.s32.totalorder %s67_s24, %s3441_s9  ;;  %p3447_p9 = scmp.lt.s32.totalorder %s3441_s9, %s3441_s9 }
  0x4f   :  { %p3448_p10 = por %p3447_p9, %p3446_p8 }
  0x51   :  { %p3449_p11 = pnand %p3448_p10, %p3442_p7 }
  0x53   :  { %3452 = shalt.err (!%p3449_p11)
}
  0x54   :  { %72 = dma.hbm_to_vmem [thread:$0]  %s3631_s5, 1024, %s67_s24, [#allocation9], %s3487_s1, %s3487_s1, %s3488_s21  }
  0x55   :  { %3475 = dma.done.wait [#allocation3], 1024  }
  0x56   :  { %3476 = vsyncadd [#allocation3], 4294966272 }
  0x57   :  { %3477 = dma.done.wait [#allocation6], 32896  }
  0x58   :  { %3478 = vsyncadd [#allocation6], 4294934400 }
  0x59   :  { %3479 = dma.done.wait [#allocation9], 5120  }
  0x5a   :  { %3480 = vsyncadd [#allocation9], 4294962176  ;;  %v2919_v0 = vld [vmem:[#allocation5 + $0x4] ss:$16 sps:$4 sm:$0xff]   ;;  %v2921_v1 = vld [vmem:[#allocation5 + $0xc] ss:$16 sps:$4 sm:$0xff]  }
  0x5b   :  { %1668 = vmatprep.subr.bf16.mxu0 %v2919_v0  ;;  %v2923_v2 = vld [vmem:[#allocation5] ss:$16 sps:$4 sm:$0xff]   ;;  %v2924_v3 = vld [vmem:[#allocation5 + $0x8] ss:$16 sps:$4 sm:$0xff]   ;;  %1832 = vmatprep.subr.bf16.mxu1 %v2921_v1  ;;  %v2925_v4 = vld [vmem:[#allocation5 + $0x24] ss:$16 sps:$4 sm:$0xff]  }
  0x5c   :  { %1669 = vmatpush1.bf16.msra.mxu0 %v2923_v2  ;;  %1833 = vmatpush1.bf16.msra.mxu1 %v2924_v3  ;;  %v2927_v5 = vld [vmem:[#allocation5 + $0x2c] ss:$16 sps:$4 sm:$0xff]   ;;  %v2929_v6 = vld [vmem:[#allocation5 + $0x20] ss:$16 sps:$4 sm:$0xff]   ;;  %v2930_v7 = vld [vmem:[#allocation5 + $0x28] ss:$16 sps:$4 sm:$0xff]  }
  0x5d   :  { %1670 = vmatprep.subr.bf16.mxu0 %v2925_v4  ;;  %1834 = vmatprep.subr.bf16.mxu1 %v2927_v5  ;;  %v2931_v8 = vld [vmem:[#allocation5 + $0x44] ss:$16 sps:$4 sm:$0xff]   ;;  %v2933_v9 = vld [vmem:[#allocation5 + $0x4c] ss:$16 sps:$4 sm:$0xff]   ;;  %v2935_v10 = vld [vmem:[#allocation5 + $0x40] ss:$16 sps:$4 sm:$0xff]  }
  0x5e   :  { %v2936_v11 = vld [vmem:[#allocation5 + $0x48] ss:$16 sps:$4 sm:$0xff]   ;;  %v2937_v12 = vld [vmem:[#allocation5 + $0x64] ss:$16 sps:$4 sm:$0xff]   ;;  %v2939_v13 = vld [vmem:[#allocation5 + $0x6c] ss:$16 sps:$4 sm:$0xff]  }
  0x5f   :  { %v2941_v14 = vld [vmem:[#allocation5 + $0x60] ss:$16 sps:$4 sm:$0xff]   ;;  %v2942_v15 = vld [vmem:[#allocation5 + $0x68] ss:$16 sps:$4 sm:$0xff]   ;;  %v2943_v16 = vld [vmem:[#allocation5 + $0x84] ss:$16 sps:$4 sm:$0xff]  }
  0x60   :  { %1671 = vmatpush1.bf16.msra.mxu0 %v2929_v6  ;;  %1835 = vmatpush1.bf16.msra.mxu1 %v2930_v7  ;;  %v2945_v17 = vld [vmem:[#allocation5 + $0x8c] ss:$16 sps:$4 sm:$0xff]   ;;  %v2947_v18 = vld [vmem:[#allocation5 + $0x80] ss:$16 sps:$4 sm:$0xff]   ;;  %v2948_v19 = vld [vmem:[#allocation5 + $0x88] ss:$16 sps:$4 sm:$0xff]  }
  0x61   :  { %1672 = vmatprep.subr.bf16.mxu0 %v2931_v8  ;;  %1836 = vmatprep.subr.bf16.mxu1 %v2933_v9  ;;  %v2949_v20 = vld [vmem:[#allocation5 + $0xa4] ss:$16 sps:$4 sm:$0xff]   ;;  %v2951_v21 = vld [vmem:[#allocation5 + $0xac] ss:$16 sps:$4 sm:$0xff]   ;;  %v2953_v22 = vld [vmem:[#allocation5 + $0xa0] ss:$16 sps:$4 sm:$0xff]  }
  0x62   :  { %v2954_v23 = vld [vmem:[#allocation5 + $0xa8] ss:$16 sps:$4 sm:$0xff]   ;;  %v2955_v24 = vld [vmem:[#allocation5 + $0xc4] ss:$16 sps:$4 sm:$0xff]   ;;  %v2957_v25 = vld [vmem:[#allocation5 + $0xcc] ss:$16 sps:$4 sm:$0xff]  }
  0x63   :  { %v2959_v26 = vld [vmem:[#allocation5 + $0xc0] ss:$16 sps:$4 sm:$0xff]   ;;  %v2960_v27 = vld [vmem:[#allocation5 + $0xc8] ss:$16 sps:$4 sm:$0xff]   ;;  %v2961_v28 = vld [vmem:[#allocation5 + $0xe4] ss:$16 sps:$4 sm:$0xff]  }
  0x64   :  { %1673 = vmatpush1.bf16.msra.mxu0 %v2935_v10  ;;  %1837 = vmatpush1.bf16.msra.mxu1 %v2936_v11  ;;  %v2963_v29 = vld [vmem:[#allocation5 + $0xec] ss:$16 sps:$4 sm:$0xff]   ;;  %v2965_v30 = vld [vmem:[#allocation5 + $0xe0] ss:$16 sps:$4 sm:$0xff]   ;;  %v2966_v31 = vld [vmem:[#allocation5 + $0xe8] ss:$16 sps:$4 sm:$0xff]  }
  0x65   :  { %1674 = vmatprep.subr.bf16.mxu0 %v2937_v12  ;;  %1838 = vmatprep.subr.bf16.mxu1 %v2939_v13  ;;  %v2967_v32 = vld [vmem:[#allocation5 + $0x104] ss:$16 sps:$4 sm:$0xff]   ;;  %v2969_v33 = vld [vmem:[#allocation5 + $0x10c] ss:$16 sps:$4 sm:$0xff]   ;;  %v2971_v34 = vld [vmem:[#allocation5 + $0x100] ss:$16 sps:$4 sm:$0xff]  }
  0x66   :  { %v2972_v35 = vld [vmem:[#allocation5 + $0x108] ss:$16 sps:$4 sm:$0xff]   ;;  %v2973_v36 = vld [vmem:[#allocation5 + $0x124] ss:$16 sps:$4 sm:$0xff]   ;;  %v2975_v37 = vld [vmem:[#allocation5 + $0x12c] ss:$16 sps:$4 sm:$0xff]  }
  0x67   :  { %v2977_v38 = vld [vmem:[#allocation5 + $0x120] ss:$16 sps:$4 sm:$0xff]   ;;  %v2978_v39 = vld [vmem:[#allocation5 + $0x128] ss:$16 sps:$4 sm:$0xff]   ;;  %v2979_v40 = vld [vmem:[#allocation5 + $0x144] ss:$16 sps:$4 sm:$0xff]  }
  0x68   :  { %1675 = vmatpush1.bf16.msra.mxu0 %v2941_v14  ;;  %1839 = vmatpush1.bf16.msra.mxu1 %v2942_v15  ;;  %v2981_v41 = vld [vmem:[#allocation5 + $0x14c] ss:$16 sps:$4 sm:$0xff]   ;;  %v2983_v42 = vld [vmem:[#allocation5 + $0x140] ss:$16 sps:$4 sm:$0xff]   ;;  %v2984_v43 = vld [vmem:[#allocation5 + $0x148] ss:$16 sps:$4 sm:$0xff]  }
  0x69   :  { %1676 = vmatprep.subr.bf16.mxu0 %v2943_v16  ;;  %1840 = vmatprep.subr.bf16.mxu1 %v2945_v17  ;;  %v2985_v44 = vld [vmem:[#allocation5 + $0x164] ss:$16 sps:$4 sm:$0xff]   ;;  %v2987_v45 = vld [vmem:[#allocation5 + $0x16c] ss:$16 sps:$4 sm:$0xff]   ;;  %v2989_v47 = vld [vmem:[#allocation5 + $0x160] ss:$16 sps:$4 sm:$0xff]  }
  0x6a   :  { %v90_v46 = vld [vmem:[#allocation2 + $0x8] sm:$0xff]  ;;  %v2991_v50 = vld [vmem:[#allocation5 + $0x184] ss:$16 sps:$4 sm:$0xff]   ;;  %v2995_v52 = vld [vmem:[#allocation5 + $0x180] ss:$16 sps:$4 sm:$0xff]   ;;  %vm3493_vm4 = vmmov 0  }
  0x6b   :  { %v98_v48 = vpack.c.bf16 %v90_v46, %v90_v46  ;;  %v2990_v49 = vld [vmem:[#allocation5 + $0x168] ss:$16 sps:$4 sm:$0xff]   ;;  %v2993_v51 = vld [vmem:[#allocation5 + $0x18c] ss:$16 sps:$4 sm:$0xff]   ;;  %v2997_v54 = vld [vmem:[#allocation5 + $0x1a4] ss:$16 sps:$4 sm:$0xff]  }
  0x6c   :  { %1677 = vmatpush1.bf16.msra.mxu0 %v2947_v18  ;;  %1841 = vmatpush1.bf16.msra.mxu1 %v2948_v19  ;;  %v2996_v53 = vld [vmem:[#allocation5 + $0x188] ss:$16 sps:$4 sm:$0xff]   ;;  %v2999_v55 = vld [vmem:[#allocation5 + $0x1ac] ss:$16 sps:$4 sm:$0xff]   ;;  %v3001_v56 = vld [vmem:[#allocation5 + $0x1a0] ss:$16 sps:$4 sm:$0xff]  }
  0x6d   :  { %1678 = vmatprep.subr.bf16.mxu0 %v2949_v20  ;;  %1842 = vmatprep.subr.bf16.mxu1 %v2951_v21  ;;  %v3002_v57 = vld [vmem:[#allocation5 + $0x1a8] ss:$16 sps:$4 sm:$0xff]   ;;  %v3003_v58 = vld [vmem:[#allocation5 + $0x1c4] ss:$16 sps:$4 sm:$0xff]   ;;  %v3005_v59 = vld [vmem:[#allocation5 + $0x1cc] ss:$16 sps:$4 sm:$0xff]  }
  0x6e   :  { %1700 = vmatprep.mubr.bf16.mxu0 %v98_v48  ;;  %1864 = vmatprep.mubr.bf16.mxu1 %v98_v48  ;;  %v3007_v60 = vld [vmem:[#allocation5 + $0x1c0] ss:$16 sps:$4 sm:$0xff]   ;;  %v3008_v61 = vld [vmem:[#allocation5 + $0x1c8] ss:$16 sps:$4 sm:$0xff]   ;;  %v3009_v62 = vld [vmem:[#allocation5 + $0x1e4] ss:$16 sps:$4 sm:$0xff]  }
  0x6f   :  { %v3011_v63 = vld [vmem:[#allocation5 + $0x1ec] ss:$16 sps:$4 sm:$0xff]   ;;  %v3013_v0 = vld [vmem:[#allocation5 + $0x1e0] ss:$16 sps:$4 sm:$0xff]   ;;  %v3014_v1 = vld [vmem:[#allocation5 + $0x1e8] ss:$16 sps:$4 sm:$0xff]  }
  0x70   :  { %1679 = vmatpush1.bf16.msra.mxu0 %v2953_v22  ;;  %1843 = vmatpush1.bf16.msra.mxu1 %v2954_v23  ;;  %v89_v2 = vld [vmem:[#allocation2] sm:$0xff]  ;;  %v3020_v4 = vld [vmem:[#allocation5 + $0x20c] ss:$16 sps:$4 sm:$0xff]   ;;  %v3018_v7 = vld [vmem:[#allocation5 + $0x208] ss:$16 sps:$4 sm:$0xff]   ;;  %s3494_s12 = smov [#allocation11]  }
  0x71   :  { %1680 = vmatprep.subr.bf16.mxu0 %v2955_v24  ;;  %1844 = vmatprep.subr.bf16.mxu1 %v2957_v25  ;;  %v3017_v3 = vld [vmem:[#allocation5 + $0x204] ss:$16 sps:$4 sm:$0xff]   ;;  %v97_v5 = vpack.c.bf16 %v89_v2, %v89_v2  ;;  %v3015_v6 = vld [vmem:[#allocation5 + $0x200] ss:$16 sps:$4 sm:$0xff]   ;;  %v3026_v9 = vld [vmem:[#allocation5 + $0x22c] ss:$16 sps:$4 sm:$0xff]  }
  0x72   :  { %v3023_v8 = vld [vmem:[#allocation5 + $0x224] ss:$16 sps:$4 sm:$0xff]   ;;  %v3021_v10 = vld [vmem:[#allocation5 + $0x220] ss:$16 sps:$4 sm:$0xff]   ;;  %v3024_v11 = vld [vmem:[#allocation5 + $0x228] ss:$16 sps:$4 sm:$0xff]  }
  0x73   :  { %v3029_v12 = vld [vmem:[#allocation5 + $0x244] ss:$16 sps:$4 sm:$0xff]   ;;  %v3032_v13 = vld [vmem:[#allocation5 + $0x24c] ss:$16 sps:$4 sm:$0xff]   ;;  %v3027_v14 = vld [vmem:[#allocation5 + $0x240] ss:$16 sps:$4 sm:$0xff]  }
  0x74   :  { %1681 = vmatpush1.bf16.msra.mxu0 %v2959_v26  ;;  %1845 = vmatpush1.bf16.msra.mxu1 %v2960_v27  ;;  %v3030_v15 = vld [vmem:[#allocation5 + $0x248] ss:$16 sps:$4 sm:$0xff]   ;;  %v3035_v16 = vld [vmem:[#allocation5 + $0x264] ss:$16 sps:$4 sm:$0xff]   ;;  %v3038_v17 = vld [vmem:[#allocation5 + $0x26c] ss:$16 sps:$4 sm:$0xff]  }
  0x75   :  { %1682 = vmatprep.subr.bf16.mxu0 %v2961_v28  ;;  %1846 = vmatprep.subr.bf16.mxu1 %v2963_v29  ;;  %v3033_v18 = vld [vmem:[#allocation5 + $0x260] ss:$16 sps:$4 sm:$0xff]   ;;  %v3036_v19 = vld [vmem:[#allocation5 + $0x268] ss:$16 sps:$4 sm:$0xff]   ;;  %v3041_v20 = vld [vmem:[#allocation5 + $0x284] ss:$16 sps:$4 sm:$0xff]  }
  0x76   :  { %v3044_v21 = vld [vmem:[#allocation5 + $0x28c] ss:$16 sps:$4 sm:$0xff]   ;;  %v3039_v22 = vld [vmem:[#allocation5 + $0x280] ss:$16 sps:$4 sm:$0xff]   ;;  %v3042_v23 = vld [vmem:[#allocation5 + $0x288] ss:$16 sps:$4 sm:$0xff]  }
  0x77   :  { %v3047_v24 = vld [vmem:[#allocation5 + $0x2a4] ss:$16 sps:$4 sm:$0xff]   ;;  %v3050_v25 = vld [vmem:[#allocation5 + $0x2ac] ss:$16 sps:$4 sm:$0xff]   ;;  %v3045_v26 = vld [vmem:[#allocation5 + $0x2a0] ss:$16 sps:$4 sm:$0xff]  }
  0x78   :  { %1683 = vmatpush1.bf16.msra.mxu0 %v2965_v30  ;;  %1847 = vmatpush1.bf16.msra.mxu1 %v2966_v31  ;;  %v3048_v27 = vld [vmem:[#allocation5 + $0x2a8] ss:$16 sps:$4 sm:$0xff]   ;;  %v3053_v28 = vld [vmem:[#allocation5 + $0x2c4] ss:$16 sps:$4 sm:$0xff]   ;;  %v3056_v29 = vld [vmem:[#allocation5 + $0x2cc] ss:$16 sps:$4 sm:$0xff]  }
  0x79   :  { %1684 = vmatprep.subr.bf16.mxu0 %v2967_v32  ;;  %1848 = vmatprep.subr.bf16.mxu1 %v2969_v33  ;;  %v92_v30 = vld [vmem:[#allocation2 + $0x18] sm:$0xff]  ;;  %v3051_v31 = vld [vmem:[#allocation5 + $0x2c0] ss:$16 sps:$4 sm:$0xff]   ;;  %v3077_v46 = vld [vmem:[#allocation5 + $0x344] ss:$16 sps:$4 sm:$0xff]   ;;  %s2496_s13 = sshll.u32 %s3494_s12, 4  ;;  %s2497_s13 = int_to_ptr.vmem [resolvable:$true] %s2496_s13 }
  0x7a   :  { %v100_v32 = vpack.c.bf16 %v92_v30, %v92_v30  ;;  %v3054_v33 = vld [vmem:[#allocation5 + $0x2c8] ss:$16 sps:$4 sm:$0xff]   ;;  %v3075_v48 = vld [vmem:[#allocation5 + $0x340] ss:$16 sps:$4 sm:$0xff]   ;;  %v3107_v2 = vld [vmem:[#allocation5 + $0x3e4] ss:$16 sps:$4 sm:$0xff]   ;;  %p3458_p13 = scmp.lt.s32.totalorder %s2497_s13, %s2497_s13 }
  0x7b   :  { %v3143_v30 = vld [vmem:[#allocation5 + $0x4a4] ss:$16 sps:$4 sm:$0xff]   ;;  %s3453_s14 = scalar_lea.vmem %s2497_s13, 128 }
  0x7c   :  { %1685 = vmatpush1.bf16.msra.mxu0 %v2971_v34  ;;  %1849 = vmatpush1.bf16.msra.mxu1 %v2972_v35  ;;  %v3059_v34 = vld [vmem:[#allocation5 + $0x2e4] ss:$16 sps:$4 sm:$0xff]   ;;  %v3062_v35 = vld [vmem:[#allocation5 + $0x2ec] ss:$16 sps:$4 sm:$0xff]   ;;  %p3454_p12 = scmp.ne.s32.totalorder %s2497_s13, %s3453_s14  ;;  %p3459_p0 = scmp.lt.s32.totalorder %s3453_s14, %s3453_s14 }
  0x7d   :  { %1686 = vmatprep.subr.bf16.mxu0 %v2973_v36  ;;  %1850 = vmatprep.subr.bf16.mxu1 %v2975_v37  ;;  %v3057_v36 = vld [vmem:[#allocation5 + $0x2e0] ss:$16 sps:$4 sm:$0xff]   ;;  %v3060_v37 = vld [vmem:[#allocation5 + $0x2e8] ss:$16 sps:$4 sm:$0xff]  }
  0x7e   :  { %p3460_p1 = por %p3459_p0, %p3458_p13 }
  0x80   :  { %1687 = vmatpush1.bf16.msra.mxu0 %v2977_v38  ;;  %1851 = vmatpush1.bf16.msra.mxu1 %v2978_v39  ;;  %v3065_v38 = vld [vmem:[#allocation5 + $0x304] ss:$16 sps:$4 sm:$0xff]   ;;  %v3068_v39 = vld [vmem:[#allocation5 + $0x30c] ss:$16 sps:$4 sm:$0xff]   ;;  %p3461_p2 = pnand %p3460_p1, %p3454_p12 }
  0x81   :  { %1688 = vmatprep.subr.bf16.mxu0 %v2979_v40  ;;  %1852 = vmatprep.subr.bf16.mxu1 %v2981_v41  ;;  %v3063_v40 = vld [vmem:[#allocation5 + $0x300] ss:$16 sps:$4 sm:$0xff]   ;;  %v3066_v41 = vld [vmem:[#allocation5 + $0x308] ss:$16 sps:$4 sm:$0xff]  }
  0x84   :  { %1689 = vmatpush1.bf16.msra.mxu0 %v2983_v42  ;;  %1853 = vmatpush1.bf16.msra.mxu1 %v2984_v43  ;;  %v3071_v42 = vld [vmem:[#allocation5 + $0x324] ss:$16 sps:$4 sm:$0xff]   ;;  %v3074_v43 = vld [vmem:[#allocation5 + $0x32c] ss:$16 sps:$4 sm:$0xff]  }
  0x85   :  { %1690 = vmatprep.subr.bf16.mxu0 %v2985_v44  ;;  %1854 = vmatprep.subr.bf16.mxu1 %v2987_v45  ;;  %v3069_v44 = vld [vmem:[#allocation5 + $0x320] ss:$16 sps:$4 sm:$0xff]   ;;  %v3072_v45 = vld [vmem:[#allocation5 + $0x328] ss:$16 sps:$4 sm:$0xff]  }
  0x88   :  { %1691 = vmatpush1.bf16.msra.mxu0 %v2989_v47  ;;  %1855 = vmatpush1.bf16.msra.mxu1 %v2990_v49  ;;  %v3080_v47 = vld [vmem:[#allocation5 + $0x34c] ss:$16 sps:$4 sm:$0xff]   ;;  %v3078_v49 = vld [vmem:[#allocation5 + $0x348] ss:$16 sps:$4 sm:$0xff]  }
  0x89   :  { %1692 = vmatprep.subr.bf16.mxu0 %v2991_v50  ;;  %1856 = vmatprep.subr.bf16.mxu1 %v2993_v51  ;;  %v3083_v50 = vld [vmem:[#allocation5 + $0x364] ss:$16 sps:$4 sm:$0xff]   ;;  %v3086_v51 = vld [vmem:[#allocation5 + $0x36c] ss:$16 sps:$4 sm:$0xff]  }
  0x8c   :  { %1693 = vmatpush1.bf16.msra.mxu0 %v2995_v52  ;;  %1857 = vmatpush1.bf16.msra.mxu1 %v2996_v53  ;;  %v3081_v52 = vld [vmem:[#allocation5 + $0x360] ss:$16 sps:$4 sm:$0xff]   ;;  %v3084_v53 = vld [vmem:[#allocation5 + $0x368] ss:$16 sps:$4 sm:$0xff]  }
  0x8d   :  { %1694 = vmatprep.subr.bf16.mxu0 %v2997_v54  ;;  %1858 = vmatprep.subr.bf16.mxu1 %v2999_v55  ;;  %v3089_v54 = vld [vmem:[#allocation5 + $0x384] ss:$16 sps:$4 sm:$0xff]   ;;  %v3092_v55 = vld [vmem:[#allocation5 + $0x38c] ss:$16 sps:$4 sm:$0xff]  }
  0x90   :  { %1695 = vmatpush1.bf16.msra.mxu0 %v3001_v56  ;;  %1859 = vmatpush1.bf16.msra.mxu1 %v3002_v57  ;;  %v3087_v56 = vld [vmem:[#allocation5 + $0x380] ss:$16 sps:$4 sm:$0xff]   ;;  %v3090_v57 = vld [vmem:[#allocation5 + $0x388] ss:$16 sps:$4 sm:$0xff]  }
  0x91   :  { %1696 = vmatprep.subr.bf16.mxu0 %v3003_v58  ;;  %1860 = vmatprep.subr.bf16.mxu1 %v3005_v59  ;;  %v3095_v58 = vld [vmem:[#allocation5 + $0x3a4] ss:$16 sps:$4 sm:$0xff]   ;;  %v3098_v59 = vld [vmem:[#allocation5 + $0x3ac] ss:$16 sps:$4 sm:$0xff]  }
  0x94   :  { %1697 = vmatpush1.bf16.msra.mxu0 %v3007_v60  ;;  %1861 = vmatpush1.bf16.msra.mxu1 %v3008_v61  ;;  %v3093_v60 = vld [vmem:[#allocation5 + $0x3a0] ss:$16 sps:$4 sm:$0xff]   ;;  %v3096_v61 = vld [vmem:[#allocation5 + $0x3a8] ss:$16 sps:$4 sm:$0xff]  }
  0x95   :  { %1698 = vmatprep.subr.bf16.mxu0 %v3009_v62  ;;  %1862 = vmatprep.subr.bf16.mxu1 %v3011_v63  ;;  %v3101_v62 = vld [vmem:[#allocation5 + $0x3c4] ss:$16 sps:$4 sm:$0xff]   ;;  %v3104_v63 = vld [vmem:[#allocation5 + $0x3cc] ss:$16 sps:$4 sm:$0xff]  }
  0x98   :  { %1699 = vmatpush1.bf16.msra.mxu0 %v3013_v0  ;;  %1863 = vmatpush1.bf16.msra.mxu1 %v3014_v1  ;;  %v3099_v0 = vld [vmem:[#allocation5 + $0x3c0] ss:$16 sps:$4 sm:$0xff]   ;;  %v3102_v1 = vld [vmem:[#allocation5 + $0x3c8] ss:$16 sps:$4 sm:$0xff]  }
  0x99   :  { %1709 = vmatprep.subr.bf16.mxu0 %v3017_v3  ;;  %1873 = vmatprep.subr.bf16.mxu1 %v3020_v4  ;;  %v3110_v3 = vld [vmem:[#allocation5 + $0x3ec] ss:$16 sps:$4 sm:$0xff]   ;;  %v3105_v4 = vld [vmem:[#allocation5 + $0x3e0] ss:$16 sps:$4 sm:$0xff]  }
  0x9b   :  { %1701 = vmatmul.mubr.bf16.vlgmr.msra.gmra.mrb[0].mxu0 %v97_v5  ;;  %1865 = vmatmul.mubr.bf16.vlgmr.msra.gmra.mrb[0].mxu1 %v97_v5  ;;  %v3108_v5 = vld [vmem:[#allocation5 + $0x3e8] ss:$16 sps:$4 sm:$0xff]  }
  0x9c   :  { %1710 = vmatpush1.bf16.msra.mxu0 %v3015_v6  ;;  %1874 = vmatpush1.bf16.msra.mxu1 %v3018_v7  ;;  %v3113_v6 = vld [vmem:[#allocation5 + $0x404] ss:$16 sps:$4 sm:$0xff]  }
  0x9d   :  { %1711 = vmatprep.subr.bf16.mxu0 %v3023_v8  ;;  %1875 = vmatprep.subr.bf16.mxu1 %v3026_v9  ;;  %v91_v7 = vld [vmem:[#allocation2 + $0x10] sm:$0xff]  ;;  %v3116_v8 = vld [vmem:[#allocation5 + $0x40c] ss:$16 sps:$4 sm:$0xff]  }
  0x9e   :  { %1741 = vmatprep.mubr.bf16.mxu0 %v100_v32  ;;  %1905 = vmatprep.mubr.bf16.mxu1 %v100_v32  ;;  %v3111_v9 = vld [vmem:[#allocation5 + $0x400] ss:$16 sps:$4 sm:$0xff]  }
  0x9f   :  { %v3141_v32 = vld [vmem:[#allocation5 + $0x4a0] ss:$16 sps:$4 sm:$0xff]  }
  0xa0   :  { %1712 = vmatpush1.bf16.msra.mxu0 %v3021_v10  ;;  %1876 = vmatpush1.bf16.msra.mxu1 %v3024_v11  ;;  %v3114_v10 = vld [vmem:[#allocation5 + $0x408] ss:$16 sps:$4 sm:$0xff]   ;;  %v99_v11 = vpack.c.bf16 %v91_v7, %v91_v7  ;;  %v3206_v7 = vld [vmem:[#allocation5 + $0x5ec] ss:$16 sps:$4 sm:$0xff]  }
  0xa1   :  { %1713 = vmatprep.subr.bf16.mxu0 %v3029_v12  ;;  %1877 = vmatprep.subr.bf16.mxu1 %v3032_v13  ;;  %v3119_v12 = vld [vmem:[#allocation5 + $0x424] ss:$16 sps:$4 sm:$0xff]   ;;  %v3122_v13 = vld [vmem:[#allocation5 + $0x42c] ss:$16 sps:$4 sm:$0xff]  }
  0xa4   :  { %1714 = vmatpush1.bf16.msra.mxu0 %v3027_v14  ;;  %1878 = vmatpush1.bf16.msra.mxu1 %v3030_v15  ;;  %v94_v14 = vld [vmem:[#allocation2 + $0x28] sm:$0xff] }
  0xa5   :  { %1715 = vmatprep.subr.bf16.mxu0 %v3035_v16  ;;  %1879 = vmatprep.subr.bf16.mxu1 %v3038_v17  ;;  %v102_v15 = vpack.c.bf16 %v94_v14, %v94_v14  ;;  %v3117_v16 = vld [vmem:[#allocation5 + $0x420] ss:$16 sps:$4 sm:$0xff]   ;;  %v3120_v17 = vld [vmem:[#allocation5 + $0x428] ss:$16 sps:$4 sm:$0xff]  }
  0xa6   :  { %v3210_v14 = vld [vmem:[#allocation5 + $0x608] ss:$16 sps:$4 sm:$0xff]  }
  0xa8   :  { %1716 = vmatpush1.bf16.msra.mxu0 %v3033_v18  ;;  %1880 = vmatpush1.bf16.msra.mxu1 %v3036_v19  ;;  %v3125_v18 = vld [vmem:[#allocation5 + $0x444] ss:$16 sps:$4 sm:$0xff]   ;;  %v3128_v19 = vld [vmem:[#allocation5 + $0x44c] ss:$16 sps:$4 sm:$0xff]  }
  0xa9   :  { %1717 = vmatprep.subr.bf16.mxu0 %v3041_v20  ;;  %1881 = vmatprep.subr.bf16.mxu1 %v3044_v21  ;;  %v3123_v20 = vld [vmem:[#allocation5 + $0x440] ss:$16 sps:$4 sm:$0xff]   ;;  %v3126_v21 = vld [vmem:[#allocation5 + $0x448] ss:$16 sps:$4 sm:$0xff]  }
  0xac   :  { %1718 = vmatpush1.bf16.msra.mxu0 %v3039_v22  ;;  %1882 = vmatpush1.bf16.msra.mxu1 %v3042_v23  ;;  %v3131_v22 = vld [vmem:[#allocation5 + $0x464] ss:$16 sps:$4 sm:$0xff]   ;;  %v3134_v23 = vld [vmem:[#allocation5 + $0x46c] ss:$16 sps:$4 sm:$0xff]  }
  0xad   :  { %1719 = vmatprep.subr.bf16.mxu0 %v3047_v24  ;;  %1883 = vmatprep.subr.bf16.mxu1 %v3050_v25  ;;  %v3129_v24 = vld [vmem:[#allocation5 + $0x460] ss:$16 sps:$4 sm:$0xff]   ;;  %v3132_v25 = vld [vmem:[#allocation5 + $0x468] ss:$16 sps:$4 sm:$0xff]  }
  0xb0   :  { %1720 = vmatpush1.bf16.msra.mxu0 %v3045_v26  ;;  %1884 = vmatpush1.bf16.msra.mxu1 %v3048_v27  ;;  %v3137_v26 = vld [vmem:[#allocation5 + $0x484] ss:$16 sps:$4 sm:$0xff]   ;;  %v3140_v27 = vld [vmem:[#allocation5 + $0x48c] ss:$16 sps:$4 sm:$0xff]  }
  0xb1   :  { %1721 = vmatprep.subr.bf16.mxu0 %v3053_v28  ;;  %1885 = vmatprep.subr.bf16.mxu1 %v3056_v29  ;;  %v3135_v28 = vld [vmem:[#allocation5 + $0x480] ss:$16 sps:$4 sm:$0xff]   ;;  %v3138_v29 = vld [vmem:[#allocation5 + $0x488] ss:$16 sps:$4 sm:$0xff]  }
  0xb4   :  { %1722 = vmatpush1.bf16.msra.mxu0 %v3051_v31  ;;  %1886 = vmatpush1.bf16.msra.mxu1 %v3054_v33  ;;  %v3146_v31 = vld [vmem:[#allocation5 + $0x4ac] ss:$16 sps:$4 sm:$0xff]   ;;  %v3144_v33 = vld [vmem:[#allocation5 + $0x4a8] ss:$16 sps:$4 sm:$0xff]  }
  0xb5   :  { %1723 = vmatprep.subr.bf16.mxu0 %v3059_v34  ;;  %1887 = vmatprep.subr.bf16.mxu1 %v3062_v35  ;;  %v3149_v34 = vld [vmem:[#allocation5 + $0x4c4] ss:$16 sps:$4 sm:$0xff]   ;;  %v3152_v35 = vld [vmem:[#allocation5 + $0x4cc] ss:$16 sps:$4 sm:$0xff]  }
  0xb8   :  { %1724 = vmatpush1.bf16.msra.mxu0 %v3057_v36  ;;  %1888 = vmatpush1.bf16.msra.mxu1 %v3060_v37  ;;  %v3147_v36 = vld [vmem:[#allocation5 + $0x4c0] ss:$16 sps:$4 sm:$0xff]   ;;  %v3150_v37 = vld [vmem:[#allocation5 + $0x4c8] ss:$16 sps:$4 sm:$0xff]  }
  0xb9   :  { %1725 = vmatprep.subr.bf16.mxu0 %v3065_v38  ;;  %1889 = vmatprep.subr.bf16.mxu1 %v3068_v39  ;;  %v3155_v38 = vld [vmem:[#allocation5 + $0x4e4] ss:$16 sps:$4 sm:$0xff]   ;;  %v3158_v39 = vld [vmem:[#allocation5 + $0x4ec] ss:$16 sps:$4 sm:$0xff]  }
  0xbc   :  { %1726 = vmatpush1.bf16.msra.mxu0 %v3063_v40  ;;  %1890 = vmatpush1.bf16.msra.mxu1 %v3066_v41  ;;  %v3153_v40 = vld [vmem:[#allocation5 + $0x4e0] ss:$16 sps:$4 sm:$0xff]   ;;  %v3156_v41 = vld [vmem:[#allocation5 + $0x4e8] ss:$16 sps:$4 sm:$0xff]  }
  0xbd   :  { %1727 = vmatprep.subr.bf16.mxu0 %v3071_v42  ;;  %1891 = vmatprep.subr.bf16.mxu1 %v3074_v43  ;;  %v3161_v42 = vld [vmem:[#allocation5 + $0x504] ss:$16 sps:$4 sm:$0xff]   ;;  %v3164_v43 = vld [vmem:[#allocation5 + $0x50c] ss:$16 sps:$4 sm:$0xff]  }
  0xc0   :  { %1728 = vmatpush1.bf16.msra.mxu0 %v3069_v44  ;;  %1892 = vmatpush1.bf16.msra.mxu1 %v3072_v45  ;;  %v3159_v44 = vld [vmem:[#allocation5 + $0x500] ss:$16 sps:$4 sm:$0xff]   ;;  %v3162_v45 = vld [vmem:[#allocation5 + $0x508] ss:$16 sps:$4 sm:$0xff]  }
  0xc1   :  { %1729 = vmatprep.subr.bf16.mxu0 %v3077_v46  ;;  %1893 = vmatprep.subr.bf16.mxu1 %v3080_v47  ;;  %v3167_v46 = vld [vmem:[#allocation5 + $0x524] ss:$16 sps:$4 sm:$0xff]   ;;  %v3170_v47 = vld [vmem:[#allocation5 + $0x52c] ss:$16 sps:$4 sm:$0xff]  }
  0xc4   :  { %1730 = vmatpush1.bf16.msra.mxu0 %v3075_v48  ;;  %1894 = vmatpush1.bf16.msra.mxu1 %v3078_v49  ;;  %v3165_v48 = vld [vmem:[#allocation5 + $0x520] ss:$16 sps:$4 sm:$0xff]   ;;  %v3168_v49 = vld [vmem:[#allocation5 + $0x528] ss:$16 sps:$4 sm:$0xff]  }
  0xc5   :  { %1731 = vmatprep.subr.bf16.mxu0 %v3083_v50  ;;  %1895 = vmatprep.subr.bf16.mxu1 %v3086_v51  ;;  %v3173_v50 = vld [vmem:[#allocation5 + $0x544] ss:$16 sps:$4 sm:$0xff]   ;;  %v3176_v51 = vld [vmem:[#allocation5 + $0x54c] ss:$16 sps:$4 sm:$0xff]  }
  0xc8   :  { %1732 = vmatpush1.bf16.msra.mxu0 %v3081_v52  ;;  %1896 = vmatpush1.bf16.msra.mxu1 %v3084_v53  ;;  %v3171_v52 = vld [vmem:[#allocation5 + $0x540] ss:$16 sps:$4 sm:$0xff]   ;;  %v3174_v53 = vld [vmem:[#allocation5 + $0x548] ss:$16 sps:$4 sm:$0xff]  }
  0xc9   :  { %1733 = vmatprep.subr.bf16.mxu0 %v3089_v54  ;;  %1897 = vmatprep.subr.bf16.mxu1 %v3092_v55  ;;  %v3179_v54 = vld [vmem:[#allocation5 + $0x564] ss:$16 sps:$4 sm:$0xff]   ;;  %v3182_v55 = vld [vmem:[#allocation5 + $0x56c] ss:$16 sps:$4 sm:$0xff]  }
  0xcc   :  { %1734 = vmatpush1.bf16.msra.mxu0 %v3087_v56  ;;  %1898 = vmatpush1.bf16.msra.mxu1 %v3090_v57  ;;  %v3177_v56 = vld [vmem:[#allocation5 + $0x560] ss:$16 sps:$4 sm:$0xff]   ;;  %v3180_v57 = vld [vmem:[#allocation5 + $0x568] ss:$16 sps:$4 sm:$0xff]  }
  0xcd   :  { %1735 = vmatprep.subr.bf16.mxu0 %v3095_v58  ;;  %1899 = vmatprep.subr.bf16.mxu1 %v3098_v59  ;;  %v3185_v58 = vld [vmem:[#allocation5 + $0x584] ss:$16 sps:$4 sm:$0xff]   ;;  %v3188_v59 = vld [vmem:[#allocation5 + $0x58c] ss:$16 sps:$4 sm:$0xff]  }
  0xd0   :  { %1736 = vmatpush1.bf16.msra.mxu0 %v3093_v60  ;;  %1900 = vmatpush1.bf16.msra.mxu1 %v3096_v61  ;;  %v3183_v60 = vld [vmem:[#allocation5 + $0x580] ss:$16 sps:$4 sm:$0xff]   ;;  %v3186_v61 = vld [vmem:[#allocation5 + $0x588] ss:$16 sps:$4 sm:$0xff]  }
  0xd1   :  { %1737 = vmatprep.subr.bf16.mxu0 %v3101_v62  ;;  %1901 = vmatprep.subr.bf16.mxu1 %v3104_v63  ;;  %v3191_v62 = vld [vmem:[#allocation5 + $0x5a4] ss:$16 sps:$4 sm:$0xff]   ;;  %v3194_v63 = vld [vmem:[#allocation5 + $0x5ac] ss:$16 sps:$4 sm:$0xff]  }
  0xd4   :  { %1738 = vmatpush1.bf16.msra.mxu0 %v3099_v0  ;;  %1902 = vmatpush1.bf16.msra.mxu1 %v3102_v1  ;;  %v3189_v0 = vld [vmem:[#allocation5 + $0x5a0] ss:$16 sps:$4 sm:$0xff]   ;;  %v3192_v1 = vld [vmem:[#allocation5 + $0x5a8] ss:$16 sps:$4 sm:$0xff]  }
  0xd5   :  { %1739 = vmatprep.subr.bf16.mxu0 %v3107_v2  ;;  %1903 = vmatprep.subr.bf16.mxu1 %v3110_v3  ;;  %v3197_v2 = vld [vmem:[#allocation5 + $0x5c4] ss:$16 sps:$4 sm:$0xff]   ;;  %v3200_v3 = vld [vmem:[#allocation5 + $0x5cc] ss:$16 sps:$4 sm:$0xff]  }
  0xd8   :  { %1740 = vmatpush1.bf16.msra.mxu0 %v3105_v4  ;;  %1904 = vmatpush1.bf16.msra.mxu1 %v3108_v5  ;;  %v3195_v4 = vld [vmem:[#allocation5 + $0x5c0] ss:$16 sps:$4 sm:$0xff]   ;;  %v3198_v5 = vld [vmem:[#allocation5 + $0x5c8] ss:$16 sps:$4 sm:$0xff]  }
  0xd9   :  { %1750 = vmatprep.subr.bf16.mxu0 %v3113_v6  ;;  %1914 = vmatprep.subr.bf16.mxu1 %v3116_v8  ;;  %v3203_v6 = vld [vmem:[#allocation5 + $0x5e4] ss:$16 sps:$4 sm:$0xff]   ;;  %v3201_v8 = vld [vmem:[#allocation5 + $0x5e0] ss:$16 sps:$4 sm:$0xff]  }
  0xdb   :  { %1742 = vmatmul.mubr.bf16.vlgmr.msra.gmra.mrb[0].mxu0 %v99_v11  ;;  %1906 = vmatmul.mubr.bf16.vlgmr.msra.gmra.mrb[0].mxu1 %v99_v11  ;;  %v93_v11 = vld [vmem:[#allocation2 + $0x20] sm:$0xff] }
  0xdc   :  { %1751 = vmatpush1.bf16.msra.mxu0 %v3111_v9  ;;  %1915 = vmatpush1.bf16.msra.mxu1 %v3114_v10  ;;  %v3204_v9 = vld [vmem:[#allocation5 + $0x5e8] ss:$16 sps:$4 sm:$0xff]   ;;  %v3209_v10 = vld [vmem:[#allocation5 + $0x604] ss:$16 sps:$4 sm:$0xff]  }
  0xdd   :  { %1752 = vmatprep.subr.bf16.mxu0 %v3119_v12  ;;  %1916 = vmatprep.subr.bf16.mxu1 %v3122_v13  ;;  %v3212_v12 = vld [vmem:[#allocation5 + $0x60c] ss:$16 sps:$4 sm:$0xff]   ;;  %v3207_v13 = vld [vmem:[#allocation5 + $0x600] ss:$16 sps:$4 sm:$0xff]  }
  0xde   :  { %1782 = vmatprep.mubr.bf16.mxu0 %v102_v15  ;;  %1946 = vmatprep.mubr.bf16.mxu1 %v102_v15  ;;  %v101_v15 = vpack.c.bf16 %v93_v11, %v93_v11  ;;  %v3302_v11 = vld [vmem:[#allocation5 + $0x7ec] ss:$16 sps:$4 sm:$0xff]  }
  0xe0   :  { %1753 = vmatpush1.bf16.msra.mxu0 %v3117_v16  ;;  %1917 = vmatpush1.bf16.msra.mxu1 %v3120_v17  ;;  %v96_v16 = vld [vmem:[#allocation2 + $0x38] sm:$0xff]  ;;  %v3215_v17 = vld [vmem:[#allocation5 + $0x624] ss:$16 sps:$4 sm:$0xff]  }
  0xe1   :  { %1754 = vmatprep.subr.bf16.mxu0 %v3125_v18  ;;  %1918 = vmatprep.subr.bf16.mxu1 %v3128_v19  ;;  %v3218_v18 = vld [vmem:[#allocation5 + $0x62c] ss:$16 sps:$4 sm:$0xff]   ;;  %v104_v19 = vpack.c.bf16 %v96_v16, %v96_v16 }
  0xe2   :  { %v3304_v16 = vld [vmem:[#allocation8 + $0xc0] sm:$0xff]  }
  0xe4   :  { %1755 = vmatpush1.bf16.msra.mxu0 %v3123_v20  ;;  %1919 = vmatpush1.bf16.msra.mxu1 %v3126_v21  ;;  %v3213_v20 = vld [vmem:[#allocation5 + $0x620] ss:$16 sps:$4 sm:$0xff]   ;;  %v3216_v21 = vld [vmem:[#allocation5 + $0x628] ss:$16 sps:$4 sm:$0xff]  }
  0xe5   :  { %1756 = vmatprep.subr.bf16.mxu0 %v3131_v22  ;;  %1920 = vmatprep.subr.bf16.mxu1 %v3134_v23  ;;  %v3221_v22 = vld [vmem:[#allocation5 + $0x644] ss:$16 sps:$4 sm:$0xff]   ;;  %v3224_v23 = vld [vmem:[#allocation5 + $0x64c] ss:$16 sps:$4 sm:$0xff]  }
  0xe8   :  { %1757 = vmatpush1.bf16.msra.mxu0 %v3129_v24  ;;  %1921 = vmatpush1.bf16.msra.mxu1 %v3132_v25  ;;  %v3219_v24 = vld [vmem:[#allocation5 + $0x640] ss:$16 sps:$4 sm:$0xff]   ;;  %v3222_v25 = vld [vmem:[#allocation5 + $0x648] ss:$16 sps:$4 sm:$0xff]  }
  0xe9   :  { %1758 = vmatprep.subr.bf16.mxu0 %v3137_v26  ;;  %1922 = vmatprep.subr.bf16.mxu1 %v3140_v27  ;;  %v3227_v26 = vld [vmem:[#allocation5 + $0x664] ss:$16 sps:$4 sm:$0xff]   ;;  %v3230_v27 = vld [vmem:[#allocation5 + $0x66c] ss:$16 sps:$4 sm:$0xff]  }
  0xec   :  { %1759 = vmatpush1.bf16.msra.mxu0 %v3135_v28  ;;  %1923 = vmatpush1.bf16.msra.mxu1 %v3138_v29  ;;  %v3225_v28 = vld [vmem:[#allocation5 + $0x660] ss:$16 sps:$4 sm:$0xff]   ;;  %v3228_v29 = vld [vmem:[#allocation5 + $0x668] ss:$16 sps:$4 sm:$0xff]  }
  0xed   :  { %1760 = vmatprep.subr.bf16.mxu0 %v3143_v30  ;;  %1924 = vmatprep.subr.bf16.mxu1 %v3146_v31  ;;  %v3233_v30 = vld [vmem:[#allocation5 + $0x684] ss:$16 sps:$4 sm:$0xff]   ;;  %v3236_v31 = vld [vmem:[#allocation5 + $0x68c] ss:$16 sps:$4 sm:$0xff]  }
  0xf0   :  { %1761 = vmatpush1.bf16.msra.mxu0 %v3141_v32  ;;  %1925 = vmatpush1.bf16.msra.mxu1 %v3144_v33  ;;  %v3231_v32 = vld [vmem:[#allocation5 + $0x680] ss:$16 sps:$4 sm:$0xff]   ;;  %v3234_v33 = vld [vmem:[#allocation5 + $0x688] ss:$16 sps:$4 sm:$0xff]  }
  0xf1   :  { %1762 = vmatprep.subr.bf16.mxu0 %v3149_v34  ;;  %1926 = vmatprep.subr.bf16.mxu1 %v3152_v35  ;;  %v3239_v34 = vld [vmem:[#allocation5 + $0x6a4] ss:$16 sps:$4 sm:$0xff]   ;;  %v3242_v35 = vld [vmem:[#allocation5 + $0x6ac] ss:$16 sps:$4 sm:$0xff]  }
  0xf4   :  { %1763 = vmatpush1.bf16.msra.mxu0 %v3147_v36  ;;  %1927 = vmatpush1.bf16.msra.mxu1 %v3150_v37  ;;  %v3237_v36 = vld [vmem:[#allocation5 + $0x6a0] ss:$16 sps:$4 sm:$0xff]   ;;  %v3240_v37 = vld [vmem:[#allocation5 + $0x6a8] ss:$16 sps:$4 sm:$0xff]  }
  0xf5   :  { %1764 = vmatprep.subr.bf16.mxu0 %v3155_v38  ;;  %1928 = vmatprep.subr.bf16.mxu1 %v3158_v39  ;;  %v3245_v38 = vld [vmem:[#allocation5 + $0x6c4] ss:$16 sps:$4 sm:$0xff]   ;;  %v3248_v39 = vld [vmem:[#allocation5 + $0x6cc] ss:$16 sps:$4 sm:$0xff]  }
  0xf8   :  { %1765 = vmatpush1.bf16.msra.mxu0 %v3153_v40  ;;  %1929 = vmatpush1.bf16.msra.mxu1 %v3156_v41  ;;  %v3243_v40 = vld [vmem:[#allocation5 + $0x6c0] ss:$16 sps:$4 sm:$0xff]   ;;  %v3246_v41 = vld [vmem:[#allocation5 + $0x6c8] ss:$16 sps:$4 sm:$0xff]  }
  0xf9   :  { %1766 = vmatprep.subr.bf16.mxu0 %v3161_v42  ;;  %1930 = vmatprep.subr.bf16.mxu1 %v3164_v43  ;;  %v3251_v42 = vld [vmem:[#allocation5 + $0x6e4] ss:$16 sps:$4 sm:$0xff]   ;;  %v3254_v43 = vld [vmem:[#allocation5 + $0x6ec] ss:$16 sps:$4 sm:$0xff]  }
  0xfc   :  { %1767 = vmatpush1.bf16.msra.mxu0 %v3159_v44  ;;  %1931 = vmatpush1.bf16.msra.mxu1 %v3162_v45  ;;  %v3249_v44 = vld [vmem:[#allocation5 + $0x6e0] ss:$16 sps:$4 sm:$0xff]   ;;  %v3252_v45 = vld [vmem:[#allocation5 + $0x6e8] ss:$16 sps:$4 sm:$0xff]  }
  0xfd   :  { %1768 = vmatprep.subr.bf16.mxu0 %v3167_v46  ;;  %1932 = vmatprep.subr.bf16.mxu1 %v3170_v47  ;;  %v3257_v46 = vld [vmem:[#allocation5 + $0x704] ss:$16 sps:$4 sm:$0xff]   ;;  %v3260_v47 = vld [vmem:[#allocation5 + $0x70c] ss:$16 sps:$4 sm:$0xff]  }
 0x100   :  { %1769 = vmatpush1.bf16.msra.mxu0 %v3165_v48  ;;  %1933 = vmatpush1.bf16.msra.mxu1 %v3168_v49  ;;  %v3255_v48 = vld [vmem:[#allocation5 + $0x700] ss:$16 sps:$4 sm:$0xff]   ;;  %v3258_v49 = vld [vmem:[#allocation5 + $0x708] ss:$16 sps:$4 sm:$0xff]  }
 0x101   :  { %1770 = vmatprep.subr.bf16.mxu0 %v3173_v50  ;;  %1934 = vmatprep.subr.bf16.mxu1 %v3176_v51  ;;  %v3263_v50 = vld [vmem:[#allocation5 + $0x724] ss:$16 sps:$4 sm:$0xff]   ;;  %v3266_v51 = vld [vmem:[#allocation5 + $0x72c] ss:$16 sps:$4 sm:$0xff]  }
 0x104   :  { %1771 = vmatpush1.bf16.msra.mxu0 %v3171_v52  ;;  %1935 = vmatpush1.bf16.msra.mxu1 %v3174_v53  ;;  %v3261_v52 = vld [vmem:[#allocation5 + $0x720] ss:$16 sps:$4 sm:$0xff]   ;;  %v3264_v53 = vld [vmem:[#allocation5 + $0x728] ss:$16 sps:$4 sm:$0xff]  }
 0x105   :  { %1772 = vmatprep.subr.bf16.mxu0 %v3179_v54  ;;  %1936 = vmatprep.subr.bf16.mxu1 %v3182_v55  ;;  %v3269_v54 = vld [vmem:[#allocation5 + $0x744] ss:$16 sps:$4 sm:$0xff]   ;;  %v3272_v55 = vld [vmem:[#allocation5 + $0x74c] ss:$16 sps:$4 sm:$0xff]  }
 0x108   :  { %1773 = vmatpush1.bf16.msra.mxu0 %v3177_v56  ;;  %1937 = vmatpush1.bf16.msra.mxu1 %v3180_v57  ;;  %v3267_v56 = vld [vmem:[#allocation5 + $0x740] ss:$16 sps:$4 sm:$0xff]   ;;  %v3270_v57 = vld [vmem:[#allocation5 + $0x748] ss:$16 sps:$4 sm:$0xff]  }
 0x109   :  { %1774 = vmatprep.subr.bf16.mxu0 %v3185_v58  ;;  %1938 = vmatprep.subr.bf16.mxu1 %v3188_v59  ;;  %v3275_v58 = vld [vmem:[#allocation5 + $0x764] ss:$16 sps:$4 sm:$0xff]   ;;  %v3278_v59 = vld [vmem:[#allocation5 + $0x76c] ss:$16 sps:$4 sm:$0xff]  }
 0x10c   :  { %1775 = vmatpush1.bf16.msra.mxu0 %v3183_v60  ;;  %1939 = vmatpush1.bf16.msra.mxu1 %v3186_v61  ;;  %v3273_v60 = vld [vmem:[#allocation5 + $0x760] ss:$16 sps:$4 sm:$0xff]   ;;  %v3276_v61 = vld [vmem:[#allocation5 + $0x768] ss:$16 sps:$4 sm:$0xff]  }
 0x10d   :  { %1776 = vmatprep.subr.bf16.mxu0 %v3191_v62  ;;  %1940 = vmatprep.subr.bf16.mxu1 %v3194_v63  ;;  %v3281_v62 = vld [vmem:[#allocation5 + $0x784] ss:$16 sps:$4 sm:$0xff]   ;;  %v3284_v63 = vld [vmem:[#allocation5 + $0x78c] ss:$16 sps:$4 sm:$0xff]  }
 0x110   :  { %1777 = vmatpush1.bf16.msra.mxu0 %v3189_v0  ;;  %1941 = vmatpush1.bf16.msra.mxu1 %v3192_v1  ;;  %v3279_v0 = vld [vmem:[#allocation5 + $0x780] ss:$16 sps:$4 sm:$0xff]   ;;  %v3282_v1 = vld [vmem:[#allocation5 + $0x788] ss:$16 sps:$4 sm:$0xff]  }
 0x111   :  { %1778 = vmatprep.subr.bf16.mxu0 %v3197_v2  ;;  %1942 = vmatprep.subr.bf16.mxu1 %v3200_v3  ;;  %v3287_v2 = vld [vmem:[#allocation5 + $0x7a4] ss:$16 sps:$4 sm:$0xff]   ;;  %v3290_v3 = vld [vmem:[#allocation5 + $0x7ac] ss:$16 sps:$4 sm:$0xff]  }
 0x114   :  { %1779 = vmatpush1.bf16.msra.mxu0 %v3195_v4  ;;  %1943 = vmatpush1.bf16.msra.mxu1 %v3198_v5  ;;  %v3285_v4 = vld [vmem:[#allocation5 + $0x7a0] ss:$16 sps:$4 sm:$0xff]   ;;  %v3288_v5 = vld [vmem:[#allocation5 + $0x7a8] ss:$16 sps:$4 sm:$0xff]  }
 0x115   :  { %1780 = vmatprep.subr.bf16.mxu0 %v3203_v6  ;;  %1944 = vmatprep.subr.bf16.mxu1 %v3206_v7  ;;  %v3293_v6 = vld [vmem:[#allocation5 + $0x7c4] ss:$16 sps:$4 sm:$0xff]   ;;  %v3296_v7 = vld [vmem:[#allocation5 + $0x7cc] ss:$16 sps:$4 sm:$0xff]  }
 0x118   :  { %1781 = vmatpush1.bf16.msra.mxu0 %v3201_v8  ;;  %1945 = vmatpush1.bf16.msra.mxu1 %v3204_v9  ;;  %v3291_v8 = vld [vmem:[#allocation5 + $0x7c0] ss:$16 sps:$4 sm:$0xff]   ;;  %v3294_v9 = vld [vmem:[#allocation5 + $0x7c8] ss:$16 sps:$4 sm:$0xff]  }
 0x119   :  { %1791 = vmatprep.subr.bf16.mxu0 %v3209_v10  ;;  %1955 = vmatprep.subr.bf16.mxu1 %v3212_v12  ;;  %v3299_v10 = vld [vmem:[#allocation5 + $0x7e4] ss:$16 sps:$4 sm:$0xff]   ;;  %v3297_v12 = vld [vmem:[#allocation5 + $0x7e0] ss:$16 sps:$4 sm:$0xff]  }
 0x11b   :  { %1783 = vmatmul.mubr.bf16.vlgmr.msra.gmra.mrb[0].mxu0 %v101_v15  ;;  %1947 = vmatmul.mubr.bf16.vlgmr.msra.gmra.mrb[0].mxu1 %v101_v15  ;;  %v3303_v15 = vld [vmem:[#allocation8 + $0x40] sm:$0xff]  }
 0x11c   :  { %1792 = vmatpush1.bf16.msra.mxu0 %v3207_v13  ;;  %1956 = vmatpush1.bf16.msra.mxu1 %v3210_v14  ;;  %v3300_v13 = vld [vmem:[#allocation5 + $0x7e8] ss:$16 sps:$4 sm:$0xff]   ;;  %v95_v14 = vld [vmem:[#allocation2 + $0x30] sm:$0xff] }
 0x11d   :  { %1793 = vmatprep.subr.bf16.mxu0 %v3215_v17  ;;  %1957 = vmatprep.subr.bf16.mxu1 %v3218_v18  ;;  %v103_v17 = vpack.c.bf16 %v95_v14, %v95_v14  ;;  %v3305_v18 = vld [vmem:[#allocation8] sm:$0xff]  }
 0x11e   :  { %1823 = vmatprep.mubr.bf16.mxu0 %v104_v19  ;;  %1987 = vmatprep.mubr.bf16.mxu1 %v104_v19  ;;  %v3306_v19 = vld [vmem:[#allocation8 + $0x80] sm:$0xff]  }
 0x120   :  { %1794 = vmatpush1.bf16.msra.mxu0 %v3213_v20  ;;  %1958 = vmatpush1.bf16.msra.mxu1 %v3216_v21  ;;  %v3307_v20 = vld [vmem:[#allocation8 + $0x48] sm:$0xff]  }
 0x121   :  { %1795 = vmatprep.subr.bf16.mxu0 %v3221_v22  ;;  %1959 = vmatprep.subr.bf16.mxu1 %v3224_v23  ;;  %v3308_v21 = vld [vmem:[#allocation8 + $0xc8] sm:$0xff]  }
 0x122   :  { %v3309_v22 = vld [vmem:[#allocation8 + $0x8] sm:$0xff]  }
 0x123   :  { %v3310_v23 = vld [vmem:[#allocation8 + $0x88] sm:$0xff]  }
 0x124   :  { %1796 = vmatpush1.bf16.msra.mxu0 %v3219_v24  ;;  %1960 = vmatpush1.bf16.msra.mxu1 %v3222_v25  ;;  %v3311_v24 = vld [vmem:[#allocation8 + $0x50] sm:$0xff]  }
 0x125   :  { %1797 = vmatprep.subr.bf16.mxu0 %v3227_v26  ;;  %1961 = vmatprep.subr.bf16.mxu1 %v3230_v27  ;;  %v3312_v25 = vld [vmem:[#allocation8 + $0xd0] sm:$0xff]  }
 0x126   :  { %v3313_v26 = vld [vmem:[#allocation8 + $0x10] sm:$0xff]  }
 0x127   :  { %v3314_v27 = vld [vmem:[#allocation8 + $0x90] sm:$0xff]  }
 0x128   :  { %1798 = vmatpush1.bf16.msra.mxu0 %v3225_v28  ;;  %1962 = vmatpush1.bf16.msra.mxu1 %v3228_v29  ;;  %v3315_v28 = vld [vmem:[#allocation8 + $0x58] sm:$0xff]  }
 0x129   :  { %1799 = vmatprep.subr.bf16.mxu0 %v3233_v30  ;;  %1963 = vmatprep.subr.bf16.mxu1 %v3236_v31  ;;  %v3316_v29 = vld [vmem:[#allocation8 + $0xd8] sm:$0xff]  }
 0x12a   :  { %v3317_v30 = vld [vmem:[#allocation8 + $0x18] sm:$0xff]  }
 0x12b   :  { %v3318_v31 = vld [vmem:[#allocation8 + $0x98] sm:$0xff]  }
 0x12c   :  { %1800 = vmatpush1.bf16.msra.mxu0 %v3231_v32  ;;  %1964 = vmatpush1.bf16.msra.mxu1 %v3234_v33  ;;  %v3319_v32 = vld [vmem:[#allocation8 + $0x60] sm:$0xff]  }
 0x12d   :  { %1801 = vmatprep.subr.bf16.mxu0 %v3239_v34  ;;  %1965 = vmatprep.subr.bf16.mxu1 %v3242_v35  ;;  %v3320_v33 = vld [vmem:[#allocation8 + $0xe0] sm:$0xff]  }
 0x12e   :  { %v3321_v34 = vld [vmem:[#allocation8 + $0x20] sm:$0xff]  }
 0x12f   :  { %v3322_v35 = vld [vmem:[#allocation8 + $0xa0] sm:$0xff]  }
 0x130   :  { %1802 = vmatpush1.bf16.msra.mxu0 %v3237_v36  ;;  %1966 = vmatpush1.bf16.msra.mxu1 %v3240_v37  ;;  %v3323_v36 = vld [vmem:[#allocation8 + $0x68] sm:$0xff]  }
 0x131   :  { %1803 = vmatprep.subr.bf16.mxu0 %v3245_v38  ;;  %1967 = vmatprep.subr.bf16.mxu1 %v3248_v39  ;;  %v3324_v37 = vld [vmem:[#allocation8 + $0xe8] sm:$0xff]  }
 0x132   :  { %v3325_v38 = vld [vmem:[#allocation8 + $0x28] sm:$0xff]  }
 0x133   :  { %v3326_v39 = vld [vmem:[#allocation8 + $0xa8] sm:$0xff]  }
 0x134   :  { %1804 = vmatpush1.bf16.msra.mxu0 %v3243_v40  ;;  %1968 = vmatpush1.bf16.msra.mxu1 %v3246_v41  ;;  %v3327_v40 = vld [vmem:[#allocation8 + $0x70] sm:$0xff]  }
 0x135   :  { %1805 = vmatprep.subr.bf16.mxu0 %v3251_v42  ;;  %1969 = vmatprep.subr.bf16.mxu1 %v3254_v43  ;;  %v3328_v41 = vld [vmem:[#allocation8 + $0xf0] sm:$0xff]  }
 0x136   :  { %v3329_v42 = vld [vmem:[#allocation8 + $0x30] sm:$0xff]  }
 0x137   :  { %v3330_v43 = vld [vmem:[#allocation8 + $0xb0] sm:$0xff]  }
 0x138   :  { %1806 = vmatpush1.bf16.msra.mxu0 %v3249_v44  ;;  %1970 = vmatpush1.bf16.msra.mxu1 %v3252_v45  ;;  %v3331_v44 = vld [vmem:[#allocation8 + $0x78] sm:$0xff]  }
 0x139   :  { %1807 = vmatprep.subr.bf16.mxu0 %v3257_v46  ;;  %1971 = vmatprep.subr.bf16.mxu1 %v3260_v47  ;;  %v3332_v45 = vld [vmem:[#allocation8 + $0xf8] sm:$0xff]  }
 0x13a   :  { %v3333_v46 = vld [vmem:[#allocation8 + $0x38] sm:$0xff]  }
 0x13b   :  { %v3334_v47 = vld [vmem:[#allocation8 + $0xb8] sm:$0xff]  }
 0x13c   :  { %1808 = vmatpush1.bf16.msra.mxu0 %v3255_v48  ;;  %1972 = vmatpush1.bf16.msra.mxu1 %v3258_v49  ;;  %v3492_v48 = vmov 0.0   ;;  %v368_v49 = vlaneseq }
 0x13d   :  { %1809 = vmatprep.subr.bf16.mxu0 %v3263_v50  ;;  %1973 = vmatprep.subr.bf16.mxu1 %v3266_v51 }
 0x13e   :  { %v369_v50 = vshrl.u32 %v368_v49, 7 }
 0x140   :  { %1810 = vmatpush1.bf16.msra.mxu0 %v3261_v52  ;;  %1974 = vmatpush1.bf16.msra.mxu1 %v3264_v53  ;;  %v370_v51 = vsub.s32 0, %v369_v50  ;;  %v378_v52 = vsub.s32 2, %v369_v50  ;;  %v105_v53 = vld [vmem:[#allocation7] ss:$2 sm:$0xf] }
 0x141   :  { %1811 = vmatprep.subr.bf16.mxu0 %v3269_v54  ;;  %1975 = vmatprep.subr.bf16.mxu1 %v3272_v55  ;;  %v374_v54 = vsub.s32 1, %v369_v50  ;;  %v382_v55 = vsub.s32 3, %v369_v50  ;;  %v2797_v50 = vld [vmem:[%s3630_s4 + $0x2] ss:$0 sm:$0xff] }
 0x144   :  { %1812 = vmatpush1.bf16.msra.mxu0 %v3267_v56  ;;  %1976 = vmatpush1.bf16.msra.mxu1 %v3270_v57  ;;  %v107_v56 = vld [vmem:[#allocation7 + $0x1] ss:$2 sm:$0xf]  ;;  %v371_v57 = vrot.slane %v105_v53, %v370_v51 }
 0x145   :  { %1813 = vmatprep.subr.bf16.mxu0 %v3275_v58  ;;  %1977 = vmatprep.subr.bf16.mxu1 %v3278_v59  ;;  %v379_v58 = vrot.slane %v105_v53, %v378_v52  ;;  %v375_v59 = vrot.slane %v105_v53, %v374_v54 }
 0x148   :  { %1814 = vmatpush1.bf16.msra.mxu0 %v3273_v60  ;;  %1978 = vmatpush1.bf16.msra.mxu1 %v3276_v61  ;;  %v383_v60 = vrot.slane %v105_v53, %v382_v55  ;;  %v2004_v61 = vrot.slane %v107_v56, %v370_v51 }
 0x149   :  { %1815 = vmatprep.subr.bf16.mxu0 %v3281_v62  ;;  %1979 = vmatprep.subr.bf16.mxu1 %v3284_v63  ;;  %v2012_v62 = vrot.slane %v107_v56, %v378_v52 }
 0x14c   :  { %1816 = vmatpush1.bf16.msra.mxu0 %v3279_v0  ;;  %1980 = vmatpush1.bf16.msra.mxu1 %v3282_v1  ;;  %v2008_v1 = vrot.slane %v107_v56, %v374_v54 }
 0x14d   :  { %1817 = vmatprep.subr.bf16.mxu0 %v3287_v2  ;;  %1981 = vmatprep.subr.bf16.mxu1 %v3290_v3  ;;  %v2016_v2 = vrot.slane %v107_v56, %v382_v55 }
 0x150   :  { %1818 = vmatpush1.bf16.msra.mxu0 %v3285_v4  ;;  %1982 = vmatpush1.bf16.msra.mxu1 %v3288_v5 }
 0x151   :  { %1819 = vmatprep.subr.bf16.mxu0 %v3293_v6  ;;  %1983 = vmatprep.subr.bf16.mxu1 %v3296_v7 }
 0x154   :  { %1820 = vmatpush1.bf16.msra.mxu0 %v3291_v8  ;;  %1984 = vmatpush1.bf16.msra.mxu1 %v3294_v9 }
 0x155   :  { %1821 = vmatprep.subr.bf16.mxu0 %v3299_v10  ;;  %1985 = vmatprep.subr.bf16.mxu1 %v3302_v11 }
 0x158   :  { %1822 = vmatpush1.bf16.msra.mxu0 %v3297_v12  ;;  %1986 = vmatpush1.bf16.msra.mxu1 %v3300_v13 }
 0x159   :  { %2806 = vmatprep.subr.bf16.mxu0 %v3303_v15  ;;  %2828 = vmatprep.subr.bf16.mxu1 %v3304_v16 }
 0x15b   :  { %1824 = vmatmul.mubr.bf16.vlgmr.msra.gmra.mrb[0].mxu0 %v103_v17  ;;  %1988 = vmatmul.mubr.bf16.vlgmr.msra.gmra.mrb[0].mxu1 %v103_v17 }
 0x15c   :  { %2807 = vmatpush3.bf16.msra.mxu0 %v3305_v18  ;;  %2829 = vmatpush3.bf16.msra.mxu1 %v3306_v19 }
 0x15d   :  { %2808 = vmatprep.subr.bf16.mxu0 %v3307_v20  ;;  %2830 = vmatprep.subr.bf16.mxu1 %v3308_v21 }
 0x160   :  { %2809 = vmatpush3.bf16.msra.mxu0 %v3309_v22  ;;  %2831 = vmatpush3.bf16.msra.mxu1 %v3310_v23  ;;  %v3335_v23 = vld [vmem:[#allocation10] sm:$0xff]  }
 0x161   :  { %2810 = vmatprep.subr.bf16.mxu0 %v3311_v24  ;;  %2832 = vmatprep.subr.bf16.mxu1 %v3312_v25 }
 0x164   :  { %2811 = vmatpush3.bf16.msra.mxu0 %v3313_v26  ;;  %2833 = vmatpush3.bf16.msra.mxu1 %v3314_v27  ;;  %v3336_v26 = vld [vmem:[#allocation10 + $0x8] sm:$0xff]   ;;  %v3337_v27 = vld [vmem:[#allocation10 + $0x10] sm:$0xff]  }
 0x165   :  { %2812 = vmatprep.subr.bf16.mxu0 %v3315_v28  ;;  %2834 = vmatprep.subr.bf16.mxu1 %v3316_v29  ;;  %v3338_v28 = vld [vmem:[#allocation10 + $0x18] sm:$0xff]   ;;  %v3339_v29 = vld [vmem:[#allocation10 + $0x20] sm:$0xff]  }
 0x168   :  { %2813 = vmatpush3.bf16.msra.mxu0 %v3317_v30  ;;  %2835 = vmatpush3.bf16.msra.mxu1 %v3318_v31  ;;  %v3340_v30 = vld [vmem:[#allocation10 + $0x28] sm:$0xff]   ;;  %v3341_v31 = vld [vmem:[#allocation10 + $0x30] sm:$0xff]  }
 0x169   :  { %2814 = vmatprep.subr.bf16.mxu0 %v3319_v32  ;;  %2836 = vmatprep.subr.bf16.mxu1 %v3320_v33  ;;  %v3342_v32 = vld [vmem:[#allocation10 + $0x38] sm:$0xff]  }
 0x16c   :  { %2815 = vmatpush3.bf16.msra.mxu0 %v3321_v34  ;;  %2837 = vmatpush3.bf16.msra.mxu1 %v3322_v35  ;;  %v2763_v35 = vld [vmem:[%s3630_s4] ss:$0 sm:$0xff] }
 0x16d   :  { %2816 = vmatprep.subr.bf16.mxu0 %v3323_v36  ;;  %2838 = vmatprep.subr.bf16.mxu1 %v3324_v37 }
 0x170   :  { %2817 = vmatpush3.bf16.msra.mxu0 %v3325_v38  ;;  %2839 = vmatpush3.bf16.msra.mxu1 %v3326_v39 }
 0x171   :  { %2818 = vmatprep.subr.bf16.mxu0 %v3327_v40  ;;  %2840 = vmatprep.subr.bf16.mxu1 %v3328_v41 }
 0x174   :  { %2819 = vmatpush3.bf16.msra.mxu0 %v3329_v42  ;;  %2841 = vmatpush3.bf16.msra.mxu1 %v3330_v43 }
 0x175   :  { %2820 = vmatprep.subr.bf16.mxu0 %v3331_v44  ;;  %2842 = vmatprep.subr.bf16.mxu1 %v3332_v45  ;;  %v2796_v45 = vld [vmem:[%s3630_s4 + $0x1] ss:$0 sm:$0xff] }
 0x178   :  { %2821 = vmatpush3.bf16.msra.mxu0 %v3333_v46  ;;  %2843 = vmatpush3.bf16.msra.mxu1 %v3334_v47 }
 0x179   :  { %2859 = vmatprep.subr.bf16.mxu0 %v3492_v48 }
 0x22e   :  { %v1825_v63 = vpop.f32.mrb[0].mxu0  ;;  %v1989_v0 = vpop.f32.mrb[0].mxu1 }
 0x22f   :  { %v2879_v3 = vadd.f32 %v1825_v63, %v371_v57  ;;  %v2881_v4 = vadd.f32 %v1989_v0, %v379_v58  ;;  %v1827_v5 = vpop.f32.mrb[1].mxu0  ;;  %v1991_v6 = vpop.f32.mrb[1].mxu1 }
 0x230   :  { %v2880_v7 = vadd.f32 %v1827_v5, %v375_v59  ;;  %v2882_v8 = vadd.f32 %v1991_v6, %v383_v60  ;;  %v1829_v9 = vpop.f32.mrb[2].mxu0  ;;  %v1993_v10 = vpop.f32.mrb[2].mxu1 }
 0x231   :  { %vm1996_vm0 = vcmp.gt.f32.partialorder %v2879_v3, 0.0  ;;  %v2021_v11 = vmul.f32 %v2879_v3, %v2004_v61  ;;  %vm1998_vm1 = vcmp.gt.f32.partialorder %v2881_v4, 0.0  ;;  %v2023_v12 = vmul.f32 %v2881_v4, %v2012_v62  ;;  %v1830_v13 = vpop.f32.mrb[3].mxu0  ;;  %v1994_v14 = vpop.f32.mrb[3].mxu1 }
 0x232   :  { %vm1997_vm2 = vcmp.gt.f32.partialorder %v2880_v7, 0.0  ;;  %v2022_v15 = vmul.f32 %v2880_v7, %v2008_v1  ;;  %vm1999_vm3 = vcmp.gt.f32.partialorder %v2882_v8, 0.0  ;;  %v2024_v16 = vmul.f32 %v2882_v8, %v2016_v2 }
 0x233   :  { %v2025_v17 = vsel %vm1996_vm0, %v2879_v3, %v2021_v11  ;;  %v2027_v18 = vsel %vm1998_vm1, %v2881_v4, %v2023_v12 }
 0x234   :  { %v2026_v19 = vsel %vm1997_vm2, %v2880_v7, %v2022_v15  ;;  %v2028_v20 = vsel %vm1999_vm3, %v2882_v8, %v2024_v16  ;;  %v2029_v24 = vpack.c.bf16 %v2025_v17, %v2025_v17  ;;  %v2031_v25 = vpack.c.bf16 %v2027_v18, %v2027_v18 }
 0x235   :  { %v2030_v21 = vpack.c.bf16 %v2026_v19, %v2026_v19  ;;  %v2032_v22 = vpack.c.bf16 %v2028_v20, %v2028_v20 }
 0x237   :  { %2325 = vmatprep.mubr.bf16.mxu0 %v2030_v21  ;;  %2365 = vmatprep.mubr.bf16.mxu1 %v2032_v22 }
 0x238   :  { %2326 = vmatmul.mubr.bf16.vlgmr.msra.gmra.mrb[4].mxu0 %v2029_v24  ;;  %2366 = vmatmul.mubr.bf16.vlgmr.msra.gmra.mrb[4].mxu1 %v2031_v25 }
 0x239   :  { %2860 = vmatpush3.bf16.msra.mxu0 %v3335_v23  ;;  %2875 = vmatprep.mubr.msk.bf16.mxu0 %vm3493_vm4, %v3492_v48 }
 0x23a   :  { %2861 = vmatprep.subr.bf16.mxu0 %v3492_v48 }
 0x23d   :  { %2862 = vmatpush3.bf16.msra.mxu0 %v3336_v26 }
 0x23e   :  { %2863 = vmatprep.subr.bf16.mxu0 %v3492_v48 }
 0x241   :  { %2864 = vmatpush3.bf16.msra.mxu0 %v3337_v27 }
 0x242   :  { %2865 = vmatprep.subr.bf16.mxu0 %v3492_v48 }
 0x245   :  { %2866 = vmatpush3.bf16.msra.mxu0 %v3338_v28 }
 0x246   :  { %2867 = vmatprep.subr.bf16.mxu0 %v3492_v48 }
 0x249   :  { %2868 = vmatpush3.bf16.msra.mxu0 %v3339_v29 }
 0x24a   :  { %2869 = vmatprep.subr.bf16.mxu0 %v3492_v48 }
 0x24d   :  { %2870 = vmatpush3.bf16.msra.mxu0 %v3340_v30 }
 0x24e   :  { %2871 = vmatprep.subr.bf16.mxu0 %v3492_v48 }
 0x251   :  { %2872 = vmatpush3.bf16.msra.mxu0 %v3341_v31 }
 0x252   :  { %2873 = vmatprep.subr.bf16.mxu0 %v3492_v48 }
 0x255   :  { %2874 = vmatpush3.bf16.msra.mxu0 %v3342_v32 }
 0x30b   :  { %v2822_v33 = vpop.f32.mrb[4].mxu0  ;;  %v2844_v34 = vpop.f32.mrb[4].mxu1 }
 0x30c   :  { %v2823_v36 = vpop.f32.mrb[5].mxu0  ;;  %v2845_v37 = vpop.f32.mrb[5].mxu1 }
 0x30d   :  { %v2824_v38 = vadd.f32 %v2823_v36, %v2822_v33  ;;  %v2846_v39 = vadd.f32 %v2845_v37, %v2844_v34  ;;  %v2825_v40 = vpop.f32.mrb[6].mxu0  ;;  %v2847_v41 = vpop.f32.mrb[6].mxu1 }
 0x30e   :  { %v2826_v42 = vpop.f32.mrb[7].mxu0  ;;  %v2848_v43 = vpop.f32.mrb[7].mxu1 }
 0x30f   :  { %v2328_v44 = vadd.f32 %v2824_v38, %v2763_v35 }
 0x311   :  { %v2368_v46 = vadd.f32 %v2846_v39, %v2328_v44 }
 0x313   :  { %vm2373_vm5 = vcmp.gt.f32.partialorder %v2368_v46, 0.0  ;;  %v2378_v47 = vmul.f32 %v2796_v45, %v2368_v46 }
 0x315   :  { %v2379_v48 = vsel %vm2373_vm5, %v2368_v46, %v2378_v47 }
 0x316   :  { %v2380_v49 = vpack.c.bf16 %v2379_v48, %v2379_v48 }
 0x318   :  { %2876 = vmatmul.mubr.bf16.vlgmr.msra.gmra.mrb[8].mxu0 %v2380_v49 }
 0x3eb   :  { %v2483_v51 = vpop.f32.mrb[8].mxu0 }
 0x3ec   :  { %v2484_v52 = vadd.f32 %v2797_v50, %v2483_v51  ;;  %v2877_v53 = vpop.f32.mrb[9].mxu0 }
 0x3ed   :  { %v2486_v54 = vpop.f32.mrb[10].mxu0 }
 0x3ee   :  { %2489 = vst [vmem:[#allocation11] sm:$0xff] %v2484_v52  ;;  %v2878_v55 = vpop.f32.mrb[11].mxu0 }
 0x3ef   :  { %3464 = shalt.err (!%p3461_p2)
}
 0x3f0   :  { %s3465_s4 = scalar_lea.hbm %s3632_s6, 128 }
 0x3f1   :  { %p3466_p3 = scmp.ne.s32.totalorder %s3632_s6, %s3465_s4  ;;  %p3469_p4 = scmp.lt.u32.totalorder %s3465_s4, %s3632_s6 }
 0x3f3   :  { %p3471_p5 = pnand %p3469_p4, %p3466_p3 }
 0x3f5   :  { %3474 = shalt.err (!%p3471_p5)
}
 0x3f6   :  { %2499 = dma.vmem_to_hbm [thread:$0]  %s2497_s13, 128, %s3632_s6, [#allocation4]  }
 0x3f7   :  { %3481 = dma.done.wait [#allocation4], 128  }
 0x3f8   :  { %3482 = vsyncadd [#allocation4], 4294967168 }
 0x3f9   :  { %2503 = vsyncpa [#allocation3], 1 }
 0x3fa   :  { %2504 = vsyncpa [#allocation6], 1 }
 0x3fb   :  { %2505 = vsyncpa [#allocation9], 1 }
 0x3fc   :  { %2506 = vsyncpa [#allocation4], 1 }

</bundles_post_ra>
